<compile_context>
chip_gen: v7x
topology: tpu7x:2x2x1
jax: 0.10.0
libtpu: 0.0.40
codegen_flags: <defaults>
</compile_context>

<pallas_src>
import functools
import math

import jax
import jax.numpy as jnp
import numpy as np
from jax import lax
from jax.experimental import pallas as pl
from jax.experimental.pallas import tpu as pltpu

LOG_2PI = float(math.log(2.0 * math.pi))
H1 = 256   # first hidden width (per tower)
H2 = 32    # second hidden width (per tower)


def _round_up(x, m):
    return ((x + m - 1) // m) * m


def _ceil_div(x, m):
    return (x + m - 1) // m


def _choose_b_tile(batch, b_tile_max):
    """Pick a 128-multiple batch tile: big tiles, small tail, >=2 grid steps."""
    b_tile_max = max(128, _round_up(b_tile_max, 128))
    if batch <= 256:
        return min(b_tile_max, _round_up(max(batch, 1), 128))
    # at least 2 steps so both v7x TensorCores get work; otherwise as few
    # (large) tiles as possible while keeping the padded tail small.
    n_tiles = max(2, _ceil_div(batch, b_tile_max))
    return min(b_tile_max, _round_up(_ceil_div(batch, n_tiles), 128))


def _vmem_limit_bytes(b_tile):
    # ~10 KiB/sample covers the lane-padded input tiles (double-buffered) and
    # the f32 z1/h1 intermediates; ~8 MiB covers the resident packed weights.
    return min(64 * 1024 * 1024, 8 * 1024 * 1024 + b_tile * 10 * 1024)


# ----------------------------------------------------------------------------
# Pallas kernel: fused actor+critic MLPs + diagonal-MVN quadratic term
# ----------------------------------------------------------------------------
def _actor_critic_kernel(x_ref, a_ref, w1T_ref, b1T_ref, w2T_ref, b2T_ref,
                         w3T_ref, b3T_ref, nhiv_ref, out_ref,
                         *, action_dim, act_dtype):
    # contract both operands on their last axis (A . B^T form).
    nt = (((1,), (1,)), ((), ()))

    # fused actor|critic layer 1: (2*H1, S) . (Bt, S)^T -> (2*H1, Bt)
    x = x_ref[...].astype(act_dtype)
    z1 = lax.dot_general(w1T_ref[...], x, nt,
                         preferred_element_type=jnp.float32)
    h1 = jnp.tanh((z1 + b1T_ref[...]).astype(act_dtype))        # (512, Bt)

    # fused block-diagonal layer 2: (2*H2, 2*H1) @ (2*H1, Bt)
    z2 = jnp.dot(w2T_ref[...], h1, preferred_element_type=jnp.float32)
    h2 = jnp.tanh((z2 + b2T_ref[...]).astype(act_dtype)).astype(jnp.float32)

    # fused block-diagonal heads (kept in f32): rows [:A] actor mean (tanh),
    # row A is the critic value.
    z3 = (jnp.dot(w3T_ref[...], h2, preferred_element_type=jnp.float32)
          + b3T_ref[...])                                        # (A+1, Bt)
    mean = jnp.tanh(z3[:action_dim, :])                          # (A,   Bt)

    # transpose the (Bt, A) action tile to (A, Bt) with a tiny identity
    # matmul on the MXU (which has plenty of slack) — avoids any wrapper-side
    # HBM transpose pass and any in-kernel relayout.
    rows = lax.broadcasted_iota(jnp.int32, (action_dim, action_dim), 0)
    cols = lax.broadcasted_iota(jnp.int32, (action_dim, action_dim), 1)
    eye = (rows == cols).astype(jnp.float32)
    aT = lax.dot_general(eye, a_ref[...], nt,
                         preferred_element_type=jnp.float32)     # (A,   Bt)

    # -0.5 * (a - mu)^T Sigma^-1 (a - mu): the -0.5/var is folded into nhiv.
    diff = aT - mean
    out_ref[0:1, :] = jnp.sum(diff * diff * nhiv_ref[...], axis=0,
                              keepdims=True)                     # (1, Bt)
    out_ref[1:2, :] = z3[action_dim:, :]                         # critic value


# ----------------------------------------------------------------------------
# One-time parameter packing (hoist out of the hot loop)
# ----------------------------------------------------------------------------
def pack_params(params, action_var, *, compute_dtype=jnp.float32):
    """Pack actor/critic weights for the fused kernel.

    compute_dtype=jnp.bfloat16 enables the bf16 layer-1/2 matmul+tanh path
    (recommended on v6e/v7x; keep float32 on v5e or when 1e-4 accuracy is
    required)."""
    (aw1, ab1, aw2, ab2, aw3, ab3,
     cw1, cb1, cw2, cb2, cw3, cb3) = params
    action_dim = aw3.shape[1]

    # layer 1: concat actor|critic along the output axis (features on rows)
    w1T = jnp.concatenate([aw1, cw1], axis=1).T.astype(compute_dtype)  # (512,S)
    b1T = jnp.concatenate([ab1, cb1], axis=1).T.astype(jnp.float32)    # (512,1)

    # layer 2: block-diagonal so actor/critic stay independent
    w2 = jnp.zeros((2 * H1, 2 * H2), jnp.float32)
    w2 = w2.at[:H1, :H2].set(aw2).at[H1:, H2:].set(cw2)
    w2T = w2.T.astype(compute_dtype)                                   # (64,512)
    b2T = jnp.concatenate([ab2, cb2], axis=1).T.astype(jnp.float32)    # (64,1)

    # heads: block-diagonal (A+1, 64): rows 0..A-1 actor, row A critic (f32)
    w3 = jnp.zeros((2 * H2, action_dim + 1), jnp.float32)
    w3 = w3.at[:H2, :action_dim].set(aw3).at[H2:, action_dim:].set(cw3)
    w3T = w3.T                                                         # (A+1,64)
    b3T = jnp.concatenate([ab3, cb3], axis=1).T.astype(jnp.float32)    # (A+1,1)

    # action_var-only math stays out of the kernel; fold the -0.5 in too.
    action_var = action_var.astype(jnp.float32)
    nhiv = (-0.5 / action_var).reshape(action_dim, 1)                  # (A,1)
    logdet = jnp.sum(jnp.log(action_var))
    logp_const = jnp.asarray(-0.5 * action_dim * LOG_2PI - 0.5 * logdet,
                             jnp.float32)
    ent_const = jnp.asarray(0.5 * action_dim * (1.0 + LOG_2PI)
                            + 0.5 * logdet, jnp.float32)
    return (w1T, b1T, w2T, b2T, w3T, b3T, nhiv, logp_const, ent_const)


# ----------------------------------------------------------------------------
# Evaluate wrapper (jit me): batch tiling + pallas_call + constant terms
# ----------------------------------------------------------------------------
def actor_critic_evaluate(state, action, packed, *, b_tile_max=2048):
    """Returns (action_logprobs [B], state_value [B], dist_entropy [B])."""
    (w1T, b1T, w2T, b2T, w3T, b3T, nhiv, logp_const, ent_const) = packed
    B, state_dim = state.shape
    action_dim = action.shape[1]
    act_dtype = w1T.dtype   # float32 or bfloat16 (set in pack_params)

    b_tile = _choose_b_tile(B, b_tile_max)
    b_pad = _round_up(B, b_tile)
    n_tiles = b_pad // b_tile

    state = state.astype(jnp.float32)
    action = action.astype(jnp.float32)
    if b_pad != B:   # only pad when the tile does not divide the batch
        state = jnp.pad(state, ((0, b_pad - B), (0, 0)))
        action = jnp.pad(action, ((0, b_pad - B), (0, 0)))

    weights = (w1T, b1T, w2T, b2T, w3T, b3T, nhiv)
    kernel = functools.partial(_actor_critic_kernel,
                               action_dim=action_dim, act_dtype=act_dtype)

    out = pl.pallas_call(
        kernel,
        grid=(n_tiles,),
        in_specs=(
            [pl.BlockSpec((b_tile, state_dim), lambda i: (i, 0)),
             pl.BlockSpec((b_tile, action_dim), lambda i: (i, 0))]
            + [pl.BlockSpec(w.shape, lambda i: (0, 0)) for w in weights]),
        out_specs=pl.BlockSpec((2, b_tile), lambda i: (0, i)),
        out_shape=jax.ShapeDtypeStruct((2, b_pad), jnp.float32),
        compiler_params=pltpu.CompilerParams(
            dimension_semantics=("parallel",),
            vmem_limit_bytes=_vmem_limit_bytes(b_tile)),
    )(state, action, *weights)

    logp = out[0, :B] + logp_const
    value = out[1, :B]
    entropy = jnp.broadcast_to(ent_const, (B,))
    return logp, value, entropy


# ----------------------------------------------------------------------------
# Deterministic parameter construction (mirrors nn.Linear / orthogonal_ init)
# ----------------------------------------------------------------------------
def _linear_params(key, fan_in, fan_out):
    kw, kb = jax.random.split(key)
    bound = 1.0 / math.sqrt(fan_in)
    w = jax.random.uniform(kw, (fan_in, fan_out), jnp.float32, -bound, bound)
    b = jax.random.uniform(kb, (1, fan_out), jnp.float32, -bound, bound)
    return w, b


def _orthogonal_weight(key, fan_in, fan_out):
    rows, cols = fan_out, fan_in
    a = jax.random.normal(key, (max(rows, cols), min(rows, cols)), jnp.float32)
    q, r = jnp.linalg.qr(a)
    q = q * jnp.sign(jnp.diagonal(r))[None, :]
    w_torch = q.T if rows < cols else q        # (fan_out, fan_in)
    return w_torch.T                           # stored as (fan_in, fan_out)


def build_params(key, state_dim, action_dim):
    keys = jax.random.split(key, 8)
    aw1, ab1 = _linear_params(keys[0], state_dim, H1)
    aw2, ab2 = _linear_params(keys[1], H1, H2)
    aw2 = _orthogonal_weight(keys[2], H1, H2)            # orthogonal_ override
    aw3, ab3 = _linear_params(keys[3], H2, action_dim)
    aw3 = _orthogonal_weight(keys[4], H2, action_dim)    # orthogonal_ override
    cw1, cb1 = _linear_params(keys[5], state_dim, H1)
    cw2, cb2 = _linear_params(keys[6], H1, H2)
    cw3, cb3 = _linear_params(keys[7], H2, 1)
    return [aw1, ab1, aw2, ab2, aw3, ab3,
            cw1, cb1, cw2, cb2, cw3, cb3]


# ----------------------------------------------------------------------------
# Pure-JAX reference for validation
# ----------------------------------------------------------------------------
def reference_evaluate(state, action, params, action_var):
    (aw1, ab1, aw2, ab2, aw3, ab3,
     cw1, cb1, cw2, cb2, cw3, cb3) = params
    h = jnp.tanh(state @ aw1 + ab1)
    h = jnp.tanh(h @ aw2 + ab2)
    mean = jnp.tanh(h @ aw3 + ab3)
    g = jnp.tanh(state @ cw1 + cb1)
    g = jnp.tanh(g @ cw2 + cb2)
    value = (g @ cw3 + cb3)[:, 0]
    var = action_var
    dim = action.shape[-1]
    diff = action - mean
    quad = jnp.sum(diff * diff / var, axis=-1)
    logdet = jnp.sum(jnp.log(var))
    logp = -0.5 * (quad + dim * LOG_2PI) - 0.5 * logdet
    ent = jnp.full((state.shape[0],),
                   0.5 * dim * (1.0 + LOG_2PI) + 0.5 * logdet)
    return logp, value, ent


if __name__ == "__main__":
    STATE_DIM, ACTION_DIM, ACTION_STD = 16, 4, 0.5

    root = jax.random.PRNGKey(0)
    k_params, k_s1, k_a1, k_s2, k_a2 = jax.random.split(root, 5)

    params = build_params(k_params, STATE_DIM, ACTION_DIM)
    action_var = jnp.full((ACTION_DIM,), ACTION_STD * ACTION_STD, jnp.float32)

    evaluate = jax.jit(actor_critic_evaluate, static_argnames=("b_tile_max",))
    packed_f32 = pack_params(params, action_var)                       # f32
    packed_bf16 = pack_params(params, action_var,
                              compute_dtype=jnp.bfloat16)              # v6e/v7x

    # --- case 1: tiny batch (single 128-wide tile, masked tail) -------------
    s1 = jax.random.normal(k_s1, (8, STATE_DIM), jnp.float32)
    a1 = jax.random.normal(k_a1, (8, ACTION_DIM), jnp.float32)
    lp, v, ent = jax.block_until_ready(evaluate(s1, a1, packed_f32))
    rlp, rv, rent = reference_evaluate(s1, a1, params, action_var)
    np.testing.assert_allclose(np.asarray(lp), np.asarray(rlp), rtol=1e-4, atol=1e-4)
    np.testing.assert_allclose(np.asarray(v), np.asarray(rv), rtol=1e-4, atol=1e-4)
    np.testing.assert_allclose(np.asarray(ent), np.asarray(rent), rtol=1e-4, atol=1e-4)

    # --- case 2: multi-tile grid (300 -> 2 parallel tiles of 256) -----------
    s2 = jax.random.normal(k_s2, (300, STATE_DIM), jnp.float32)
    a2 = jax.random.normal(k_a2, (300, ACTION_DIM), jnp.float32)
    lp, v, ent = jax.block_until_ready(evaluate(s2, a2, packed_f32))
    rlp, rv, rent = reference_evaluate(s2, a2, params, action_var)
    np.testing.assert_allclose(np.asarray(lp), np.asarray(rlp), rtol=1e-4, atol=1e-4)
    np.testing.assert_allclose(np.asarray(v), np.asarray(rv), rtol=1e-4, atol=1e-4)
    np.testing.assert_allclose(np.asarray(ent), np.asarray(rent), rtol=1e-4, atol=1e-4)

    # --- case 3: bf16 layer-1/2 path (EUP speedup on v6e/v7x), loose tol ----
    lp_b, v_b, _ = jax.block_until_ready(evaluate(s2, a2, packed_bf16))
    np.testing.assert_allclose(np.asarray(lp_b), np.asarray(rlp),
                               rtol=5e-2, atol=2.5e-1)
    np.testing.assert_allclose(np.asarray(v_b), np.asarray(rv),
                               rtol=5e-2, atol=2e-2)

    print("KERNEL_OK")
</pallas_src>

<mosaic_0001>
module attributes {stable_mosaic.version = 11 : i64} {
  func.func @_actor_critic_kernel(%arg0: i32, %arg1: memref<128x16xf32, #tpu.memory_space<vmem>>, %arg2: memref<128x4xf32, #tpu.memory_space<vmem>>, %arg3: memref<512x16xf32, #tpu.memory_space<vmem>>, %arg4: memref<512x1xf32, #tpu.memory_space<vmem>>, %arg5: memref<64x512xf32, #tpu.memory_space<vmem>>, %arg6: memref<64x1xf32, #tpu.memory_space<vmem>>, %arg7: memref<5x64xf32, #tpu.memory_space<vmem>>, %arg8: memref<5x1xf32, #tpu.memory_space<vmem>>, %arg9: memref<4x1xf32, #tpu.memory_space<vmem>>, %arg10: memref<2x128xf32, #tpu.memory_space<vmem>>) attributes {dimension_semantics = [#tpu.dimension_semantics<parallel>], iteration_bounds = array<i64: 1>, scalar_prefetch = 0 : i64, scratch_operands = 0 : i64, tpu.core_type = #tpu.core_type<tc>, window_params = [{transform_indices = @transform_0, window_bounds = array<i64: 128, 16>}, {transform_indices = @transform_1, window_bounds = array<i64: 128, 4>}, {pipeline_mode = #tpu.pipeline_mode<synchronous>, transform_indices = @transform_2, window_bounds = array<i64: 512, 16>}, {pipeline_mode = #tpu.pipeline_mode<synchronous>, transform_indices = @transform_3, window_bounds = array<i64: 512, 1>}, {pipeline_mode = #tpu.pipeline_mode<synchronous>, transform_indices = @transform_4, window_bounds = array<i64: 64, 512>}, {pipeline_mode = #tpu.pipeline_mode<synchronous>, transform_indices = @transform_5, window_bounds = array<i64: 64, 1>}, {pipeline_mode = #tpu.pipeline_mode<synchronous>, transform_indices = @transform_6, window_bounds = array<i64: 5, 64>}, {pipeline_mode = #tpu.pipeline_mode<synchronous>, transform_indices = @transform_7, window_bounds = array<i64: 5, 1>}, {pipeline_mode = #tpu.pipeline_mode<synchronous>, transform_indices = @transform_8, window_bounds = array<i64: 4, 1>}, {transform_indices = @transform_9, window_bounds = array<i64: 2, 128>}]} {
    %c0 = arith.constant 0 : index
    %c0_0 = arith.constant 0 : index
    %0 = vector.load %arg1[%c0, %c0_0] : memref<128x16xf32, #tpu.memory_space<vmem>>, vector<128x16xf32>
    %c0_1 = arith.constant 0 : index
    %c0_2 = arith.constant 0 : index
    %1 = vector.load %arg3[%c0_1, %c0_2] : memref<512x16xf32, #tpu.memory_space<vmem>>, vector<512x16xf32>
    %cst = arith.constant dense<0.000000e+00> : vector<512x128xf32>
    %2 = tpu.matmul %1, %0, %cst {dimension_numbers = #tpu.dot_dimension_numbers<[1], [1], [0], [0], [0, 0, 1, 0], [], []>} : vector<512x16xf32>, vector<128x16xf32>, vector<512x128xf32> -> vector<512x128xf32>
    %c0_3 = arith.constant 0 : index
    %c0_4 = arith.constant 0 : index
    %3 = vector.load %arg4[%c0_3, %c0_4] : memref<512x1xf32, #tpu.memory_space<vmem>>, vector<512x1xf32>
    %4 = vector.broadcast %3 : vector<512x1xf32> to vector<512x128xf32>
    %5 = arith.addf %2, %4 : vector<512x128xf32>
    %6 = math.tanh %5 : vector<512x128xf32>
    %c0_5 = arith.constant 0 : index
    %c0_6 = arith.constant 0 : index
    %7 = vector.load %arg5[%c0_5, %c0_6] : memref<64x512xf32, #tpu.memory_space<vmem>>, vector<64x512xf32>
    %cst_7 = arith.constant dense<0.000000e+00> : vector<64x128xf32>
    %8 = tpu.matmul %7, %6, %cst_7 {dimension_numbers = #tpu.dot_dimension_numbers<[1], [0], [0], [1], [0, 0, 1, 1], [], []>} : vector<64x512xf32>, vector<512x128xf32>, vector<64x128xf32> -> vector<64x128xf32>
    %c0_8 = arith.constant 0 : index
    %c0_9 = arith.constant 0 : index
    %9 = vector.load %arg6[%c0_8, %c0_9] : memref<64x1xf32, #tpu.memory_space<vmem>>, vector<64x1xf32>
    %10 = vector.broadcast %9 : vector<64x1xf32> to vector<64x128xf32>
    %11 = arith.addf %8, %10 : vector<64x128xf32>
    %12 = math.tanh %11 : vector<64x128xf32>
    %c0_10 = arith.constant 0 : index
    %c0_11 = arith.constant 0 : index
    %13 = vector.load %arg7[%c0_10, %c0_11] : memref<5x64xf32, #tpu.memory_space<vmem>>, vector<5x64xf32>
    %cst_12 = arith.constant dense<0.000000e+00> : vector<5x128xf32>
    %14 = tpu.matmul %13, %12, %cst_12 {dimension_numbers = #tpu.dot_dimension_numbers<[1], [0], [0], [1], [0, 0, 1, 1], [], []>} : vector<5x64xf32>, vector<64x128xf32>, vector<5x128xf32> -> vector<5x128xf32>
    %c0_13 = arith.constant 0 : index
    %c0_14 = arith.constant 0 : index
    %15 = vector.load %arg8[%c0_13, %c0_14] : memref<5x1xf32, #tpu.memory_space<vmem>>, vector<5x1xf32>
    %16 = vector.broadcast %15 : vector<5x1xf32> to vector<5x128xf32>
    %17 = arith.addf %14, %16 : vector<5x128xf32>
    %18 = vector.extract_strided_slice %17 {offsets = [0, 0], sizes = [4, 128], strides = [1, 1]} : vector<5x128xf32> to vector<4x128xf32>
    %19 = math.tanh %18 : vector<4x128xf32>
    %20 = tpu.iota {dimensions = array<i32: 0>} : vector<4x4xi32>
    %21 = tpu.iota {dimensions = array<i32: 1>} : vector<4x4xi32>
    %22 = arith.cmpi eq, %20, %21 : vector<4x4xi32>
    %23 = arith.extui %22 : vector<4x4xi1> to vector<4x4xi32>
    %24 = arith.sitofp %23 : vector<4x4xi32> to vector<4x4xf32>
    %c0_15 = arith.constant 0 : index
    %c0_16 = arith.constant 0 : index
    %25 = vector.load %arg2[%c0_15, %c0_16] : memref<128x4xf32, #tpu.memory_space<vmem>>, vector<128x4xf32>
    %cst_17 = arith.constant dense<0.000000e+00> : vector<4x128xf32>
    %26 = tpu.matmul %24, %25, %cst_17 {dimension_numbers = #tpu.dot_dimension_numbers<[1], [1], [0], [0], [0, 0, 1, 0], [], []>} : vector<4x4xf32>, vector<128x4xf32>, vector<4x128xf32> -> vector<4x128xf32>
    %27 = arith.subf %26, %19 : vector<4x128xf32>
    %28 = arith.mulf %27, %27 : vector<4x128xf32>
    %c0_18 = arith.constant 0 : index
    %c0_19 = arith.constant 0 : index
    %29 = vector.load %arg9[%c0_18, %c0_19] : memref<4x1xf32, #tpu.memory_space<vmem>>, vector<4x1xf32>
    %30 = vector.broadcast %29 : vector<4x1xf32> to vector<4x128xf32>
    %31 = arith.mulf %28, %30 : vector<4x128xf32>
    %cst_20 = arith.constant dense<0.000000e+00> : vector<128xf32>
    %32 = vector.multi_reduction <add>, %31, %cst_20 [0] : vector<4x128xf32> to vector<128xf32>
    %33 = vector.shape_cast %32 : vector<128xf32> to vector<1x128xf32>
    %c0_21 = arith.constant 0 : index
    %c0_22 = arith.constant 0 : index
    %34 = vector.load %arg10[%c0_21, %c0_22] : memref<2x128xf32, #tpu.memory_space<vmem>>, vector<1x128xf32>
    tpu.vector_store %arg10[%c0_21, %c0_22], %33 {strides = array<i32>} : memref<2x128xf32, #tpu.memory_space<vmem>>, vector<1x128xf32>,
    %35 = vector.extract_strided_slice %17 {offsets = [4, 0], sizes = [1, 128], strides = [1, 1]} : vector<5x128xf32> to vector<1x128xf32>
    %c1 = arith.constant 1 : index
    %c0_23 = arith.constant 0 : index
    %36 = vector.load %arg10[%c1, %c0_23] : memref<2x128xf32, #tpu.memory_space<vmem>>, vector<1x128xf32>
    tpu.vector_store %arg10[%c1, %c0_23], %35 {strides = array<i32>} : memref<2x128xf32, #tpu.memory_space<vmem>>, vector<1x128xf32>,
    return
  }
  func.func @transform_0(%arg0: i32) -> (i32, i32) {
    %c0_i32 = arith.constant 0 : i32
    %c0_i32_0 = arith.constant 0 : i32
    return %arg0, %c0_i32 : i32, i32
  }
  func.func @transform_1(%arg0: i32) -> (i32, i32) {
    %c0_i32 = arith.constant 0 : i32
    %c0_i32_0 = arith.constant 0 : i32
    return %arg0, %c0_i32 : i32, i32
  }
  func.func @transform_2(%arg0: i32) -> (i32, i32) {
    %c0_i32 = arith.constant 0 : i32
    %c0_i32_0 = arith.constant 0 : i32
    %c0_i32_1 = arith.constant 0 : i32
    return %c0_i32, %c0_i32_0 : i32, i32
  }
  func.func @transform_3(%arg0: i32) -> (i32, i32) {
    %c0_i32 = arith.constant 0 : i32
    %c0_i32_0 = arith.constant 0 : i32
    %c0_i32_1 = arith.constant 0 : i32
    return %c0_i32, %c0_i32_0 : i32, i32
  }
  func.func @transform_4(%arg0: i32) -> (i32, i32) {
    %c0_i32 = arith.constant 0 : i32
    %c0_i32_0 = arith.constant 0 : i32
    %c0_i32_1 = arith.constant 0 : i32
    return %c0_i32, %c0_i32_0 : i32, i32
  }
  func.func @transform_5(%arg0: i32) -> (i32, i32) {
    %c0_i32 = arith.constant 0 : i32
    %c0_i32_0 = arith.constant 0 : i32
    %c0_i32_1 = arith.constant 0 : i32
    return %c0_i32, %c0_i32_0 : i32, i32
  }
  func.func @transform_6(%arg0: i32) -> (i32, i32) {
    %c0_i32 = arith.constant 0 : i32
    %c0_i32_0 = arith.constant 0 : i32
    %c0_i32_1 = arith.constant 0 : i32
    return %c0_i32, %c0_i32_0 : i32, i32
  }
  func.func @transform_7(%arg0: i32) -> (i32, i32) {
    %c0_i32 = arith.constant 0 : i32
    %c0_i32_0 = arith.constant 0 : i32
    %c0_i32_1 = arith.constant 0 : i32
    return %c0_i32, %c0_i32_0 : i32, i32
  }
  func.func @transform_8(%arg0: i32) -> (i32, i32) {
    %c0_i32 = arith.constant 0 : i32
    %c0_i32_0 = arith.constant 0 : i32
    %c0_i32_1 = arith.constant 0 : i32
    return %c0_i32, %c0_i32_0 : i32, i32
  }
  func.func @transform_9(%arg0: i32) -> (i32, i32) {
    %c0_i32 = arith.constant 0 : i32
    %c0_i32_0 = arith.constant 0 : i32
    return %c0_i32, %arg0 : i32, i32
  }
}

</mosaic_0001>

<bundles_post_ra>
// kernel: actor_critic_evaluate.1
= control target key start
LH: loop header
LB: loop body
LE: loop exit
PB: predicated region body
PF: predicated region fallthrough
CT: control target
= control target key end

     0   :  { %vm496_vm0 = vcmask 130048   ;;  %v2541_v3 = vmov 0   ;;  %vm2543_vm2 = vmmov 0   ;;  %vm1491_vm3 = vcmask 523264   ;;  %s3631_s0 = inlined_call_operand.vmem [shape: f32[128,16], index: 0, kind: input, shape index: {}]   ;;  %s3632_s3 = inlined_call_operand.vmem [shape: f32[512,1], index: 3, kind: input, shape index: {}]   ;;  %s3633_s2 = inlined_call_operand.vmem [shape: f32[512,16], index: 2, kind: input, shape index: {}]   ;;  %s3634_s5 = inlined_call_operand.vmem [shape: f32[64,1], index: 5, kind: input, shape index: {}]   ;;  %s3635_s7 = inlined_call_operand.vmem [shape: f32[5,1], index: 7, kind: input, shape index: {}]   ;;  %s3636_s8 = inlined_call_operand.vmem [shape: f32[4,1], index: 8, kind: input, shape index: {}]   ;;  %s3637_s4 = inlined_call_operand.vmem [shape: f32[64,512], index: 4, kind: input, shape index: {}]   ;;  %s3638_s6 = inlined_call_operand.vmem [shape: f32[5,64], index: 6, kind: input, shape index: {}]   ;;  %s3639_s1 = inlined_call_operand.vmem [shape: f32[128,4], index: 1, kind: input, shape index: {}]   ;;  %s3640_s9 = inlined_call_operand.vmem [shape: f32[2,128], index: 9, kind: output, shape index: {}]  }
   0x1   :  { %v32_v0 = vld [vmem:[%s3631_s0] sm:$0xff]  ;;  %v33_v1 = vld [vmem:[%s3631_s0 + $0x8] sm:$0xff]  ;;  %vm2603_vm1 = vmpackc.low %vm496_vm0, %vm496_vm0  ;;  %2394 = vset.pattern.permute.xlu1 %v2541_v3  ;;  %2393 = vset.pattern.permute.xlu0 %v2541_v3  ;;  %vm1589_vm4 = vcmask 31744   ;;  %vm1720_vm7 = vcmask 1043456  }
   0x2   :  { %v2233_v4 = vpack.c.bf16 %v33_v1, %v32_v0  ;;  %v128_v5 = vld [vmem:[%s3632_s3 + $0x80] sm:$0xff]  ;;  %v34_v7 = vld [vmem:[%s3631_s0 + $0x10] sm:$0xff]  ;;  %v35_v8 = vld [vmem:[%s3631_s0 + $0x18] sm:$0xff] }
   0x3   :  { %v112_v6 = vld [vmem:[%s3632_s3] sm:$0xff]  ;;  %258 = vperm.xlu0 %2393, %v128_v5   ;;  %v2239_v9 = vpack.c.bf16 %v35_v8, %v34_v7  ;;  %v129_v10 = vld [vmem:[%s3632_s3 + $0x88] sm:$0xff]  ;;  %v130_v14 = vld [vmem:[%s3632_s3 + $0x90] sm:$0xff] }
   0x4   :  { %178 = vperm.xlu1 %2394, %v112_v6   ;;  %2235 = vmatprep.subr.msk.bf16.mxu0 %vm2603_vm1, %v2233_v4  ;;  %v113_v11 = vld [vmem:[%s3632_s3 + $0x8] sm:$0xff]  ;;  %v36_v12 = vld [vmem:[%s3631_s0 + $0x20] sm:$0xff]  ;;  %v131_v15 = vld [vmem:[%s3632_s3 + $0x98] sm:$0xff] }
   0x5   :  { %2238 = vmatpush3.bf16.xpose.msk.msra.mxu0 %vm2603_vm1, %v2233_v4  ;;  %v37_v13 = vld [vmem:[%s3631_s0 + $0x28] sm:$0xff]  ;;  %v114_v17 = vld [vmem:[%s3632_s3 + $0x10] sm:$0xff]  ;;  %v115_v18 = vld [vmem:[%s3632_s3 + $0x18] sm:$0xff] }
   0x6   :  { %2241 = vmatprep.subr.msk.bf16.mxu0 %vm2603_vm1, %v2239_v9  ;;  %v2245_v16 = vpack.c.bf16 %v37_v13, %v36_v12  ;;  %v38_v19 = vld [vmem:[%s3631_s0 + $0x30] sm:$0xff]  ;;  %v39_v20 = vld [vmem:[%s3631_s0 + $0x38] sm:$0xff]  ;;  %v132_v21 = vld [vmem:[%s3632_s3 + $0xa0] sm:$0xff] }
   0x7   :  { %263 = vperm.xlu0 %2393, %v129_v10   ;;  %v133_v22 = vld [vmem:[%s3632_s3 + $0xa8] sm:$0xff]  ;;  %v48_v23 = vld [vmem:[%s3633_s2] sm:$0xff]  ;;  %v2251_v24 = vpack.c.bf16 %v39_v20, %v38_v19  ;;  %v134_v29 = vld [vmem:[%s3632_s3 + $0xb0] sm:$0xff] }
   0x8   :  { %183 = vperm.xlu1 %2394, %v113_v11   ;;  %2083 = vmatprep.mubr.msk.f32.mxu0 %vm496_vm0, %v48_v23  ;;  %v116_v25 = vld [vmem:[%s3632_s3 + $0x20] sm:$0xff]  ;;  %v117_v26 = vld [vmem:[%s3632_s3 + $0x28] sm:$0xff]  ;;  %v135_v30 = vld [vmem:[%s3632_s3 + $0xb8] sm:$0xff] }
   0x9   :  { %v40_v27 = vld [vmem:[%s3631_s0 + $0x40] sm:$0xff]  ;;  %v41_v28 = vld [vmem:[%s3631_s0 + $0x48] sm:$0xff]  ;;  %v118_v32 = vld [vmem:[%s3632_s3 + $0x30] sm:$0xff] }
   0xa   :  { %v2257_v31 = vpack.c.bf16 %v41_v28, %v40_v27  ;;  %v119_v33 = vld [vmem:[%s3632_s3 + $0x38] sm:$0xff]  ;;  %v42_v34 = vld [vmem:[%s3631_s0 + $0x50] sm:$0xff]  ;;  %v136_v36 = vld [vmem:[%s3632_s3 + $0xc0] sm:$0xff] }
   0xb   :  { %268 = vperm.xlu0 %2393, %v130_v14   ;;  %v43_v35 = vld [vmem:[%s3631_s0 + $0x58] sm:$0xff]  ;;  %v137_v37 = vld [vmem:[%s3632_s3 + $0xc8] sm:$0xff]  ;;  %v120_v39 = vld [vmem:[%s3632_s3 + $0x40] sm:$0xff] }
   0xc   :  { %273 = vperm.xlu1 %2394, %v131_v15   ;;  %v2263_v38 = vpack.c.bf16 %v43_v35, %v42_v34  ;;  %v121_v40 = vld [vmem:[%s3632_s3 + $0x48] sm:$0xff]  ;;  %v44_v41 = vld [vmem:[%s3631_s0 + $0x60] sm:$0xff]  ;;  %v138_v43 = vld [vmem:[%s3632_s3 + $0xd0] sm:$0xff] }
   0xd   :  { %2244 = vmatpush3.bf16.xpose.msk.msra.mxu0 %vm2603_vm1, %v2239_v9  ;;  %v45_v42 = vld [vmem:[%s3631_s0 + $0x68] sm:$0xff]  ;;  %v139_v44 = vld [vmem:[%s3632_s3 + $0xd8] sm:$0xff]  ;;  %v122_v46 = vld [vmem:[%s3632_s3 + $0x50] sm:$0xff] }
   0xe   :  { %2247 = vmatprep.subr.msk.bf16.mxu0 %vm2603_vm1, %v2245_v16  ;;  %v2269_v45 = vpack.c.bf16 %v45_v42, %v44_v41  ;;  %v123_v47 = vld [vmem:[%s3632_s3 + $0x58] sm:$0xff]  ;;  %v46_v48 = vld [vmem:[%s3631_s0 + $0x70] sm:$0xff]  ;;  %v140_v50 = vld [vmem:[%s3632_s3 + $0xe0] sm:$0xff] }
   0xf   :  { %188 = vperm.xlu0 %2393, %v114_v17   ;;  %v47_v49 = vld [vmem:[%s3631_s0 + $0x78] sm:$0xff]  ;;  %v141_v51 = vld [vmem:[%s3632_s3 + $0xe8] sm:$0xff]  ;;  %v124_v53 = vld [vmem:[%s3632_s3 + $0x60] sm:$0xff] }
  0x10   :  { %193 = vperm.xlu1 %2394, %v115_v18   ;;  %v2275_v52 = vpack.c.bf16 %v47_v49, %v46_v48  ;;  %v125_v54 = vld [vmem:[%s3632_s3 + $0x68] sm:$0xff]  ;;  %v142_v55 = vld [vmem:[%s3632_s3 + $0xf0] sm:$0xff]  ;;  %v143_v56 = vld [vmem:[%s3632_s3 + $0xf8] sm:$0xff] }
  0x11   :  { %v126_v57 = vld [vmem:[%s3632_s3 + $0x70] sm:$0xff]  ;;  %v127_v58 = vld [vmem:[%s3632_s3 + $0x78] sm:$0xff]  ;;  %v160_v59 = vld [vmem:[%s3632_s3 + $0x180] sm:$0xff] }
  0x12   :  { %v161_v60 = vld [vmem:[%s3632_s3 + $0x188] sm:$0xff]  ;;  %v50_v62 = vld [vmem:[%s3633_s2 + $0x10] sm:$0xff]  ;;  %v144_v63 = vld [vmem:[%s3632_s3 + $0x100] sm:$0xff] }
  0x13   :  { %278 = vperm.xlu0 %2393, %v132_v21   ;;  %v49_v61 = vld [vmem:[%s3633_s2 + $0x8] sm:$0xff]  ;;  %v51_v1 = vld [vmem:[%s3633_s2 + $0x18] sm:$0xff]  ;;  %v52_v2 = vld [vmem:[%s3633_s2 + $0x20] sm:$0xff] }
  0x14   :  { %283 = vperm.xlu1 %2394, %v133_v22   ;;  %v145_v0 = vld [vmem:[%s3632_s3 + $0x108] sm:$0xff]  ;;  %v162_v3 = vld [vmem:[%s3632_s3 + $0x190] sm:$0xff]  ;;  %v163_v4 = vld [vmem:[%s3632_s3 + $0x198] sm:$0xff] }
  0x15   :  { %2250 = vmatpush3.bf16.xpose.msk.msra.mxu0 %vm2603_vm1, %v2245_v16  ;;  %v53_v5 = vld [vmem:[%s3633_s2 + $0x28] sm:$0xff]  ;;  %v54_v6 = vld [vmem:[%s3633_s2 + $0x30] sm:$0xff]  ;;  %v147_v8 = vld [vmem:[%s3632_s3 + $0x118] sm:$0xff] }
  0x16   :  { %2253 = vmatprep.subr.msk.bf16.mxu0 %vm2603_vm1, %v2251_v24  ;;  %v146_v7 = vld [vmem:[%s3632_s3 + $0x110] sm:$0xff]  ;;  %v55_v9 = vld [vmem:[%s3633_s2 + $0x38] sm:$0xff]  ;;  %v56_v10 = vld [vmem:[%s3633_s2 + $0x40] sm:$0xff] }
  0x17   :  { %198 = vperm.xlu0 %2393, %v116_v25   ;;  %v164_v11 = vld [vmem:[%s3632_s3 + $0x1a0] sm:$0xff]  ;;  %v165_v12 = vld [vmem:[%s3632_s3 + $0x1a8] sm:$0xff]  ;;  %v58_v14 = vld [vmem:[%s3633_s2 + $0x50] sm:$0xff] }
  0x18   :  { %203 = vperm.xlu1 %2394, %v117_v26   ;;  %v57_v13 = vld [vmem:[%s3633_s2 + $0x48] sm:$0xff]  ;;  %v148_v15 = vld [vmem:[%s3632_s3 + $0x120] sm:$0xff]  ;;  %v59_v17 = vld [vmem:[%s3633_s2 + $0x58] sm:$0xff] }
  0x19   :  { %v149_v16 = vld [vmem:[%s3632_s3 + $0x128] sm:$0xff]  ;;  %v60_v18 = vld [vmem:[%s3633_s2 + $0x60] sm:$0xff]  ;;  %v166_v19 = vld [vmem:[%s3632_s3 + $0x1b0] sm:$0xff] }
  0x1a   :  { %v167_v20 = vld [vmem:[%s3632_s3 + $0x1b8] sm:$0xff]  ;;  %v61_v21 = vld [vmem:[%s3633_s2 + $0x68] sm:$0xff]  ;;  %v62_v22 = vld [vmem:[%s3633_s2 + $0x70] sm:$0xff] }
  0x1b   :  { %288 = vperm.xlu0 %2393, %v134_v29   ;;  %v150_v23 = vld [vmem:[%s3632_s3 + $0x130] sm:$0xff]  ;;  %v63_v25 = vld [vmem:[%s3633_s2 + $0x78] sm:$0xff]  ;;  %v64_v26 = vld [vmem:[%s3633_s2 + $0x80] sm:$0xff] }
  0x1c   :  { %293 = vperm.xlu1 %2394, %v135_v30   ;;  %v168_v27 = vld [vmem:[%s3632_s3 + $0x1c0] sm:$0xff]  ;;  %v169_v28 = vld [vmem:[%s3632_s3 + $0x1c8] sm:$0xff]  ;;  %v66_v30 = vld [vmem:[%s3633_s2 + $0x90] sm:$0xff] }
  0x1d   :  { %2256 = vmatpush3.bf16.xpose.msk.msra.mxu0 %vm2603_vm1, %v2251_v24  ;;  %v151_v24 = vld [vmem:[%s3632_s3 + $0x138] sm:$0xff]  ;;  %v65_v29 = vld [vmem:[%s3633_s2 + $0x88] sm:$0xff]  ;;  %v68_v34 = vld [vmem:[%s3633_s2 + $0xa0] sm:$0xff] }
  0x1e   :  { %2259 = vmatprep.subr.msk.bf16.mxu0 %vm2603_vm1, %v2257_v31  ;;  %v170_v35 = vld [vmem:[%s3632_s3 + $0x1d0] sm:$0xff]  ;;  %v71_v41 = vld [vmem:[%s3633_s2 + $0xb8] sm:$0xff]  ;;  %v72_v42 = vld [vmem:[%s3633_s2 + $0xc0] sm:$0xff] }
  0x1f   :  { %208 = vperm.xlu0 %2393, %v118_v32   ;;  %v153_v32 = vld [vmem:[%s3632_s3 + $0x148] sm:$0xff]  ;;  %v75_v49 = vld [vmem:[%s3633_s2 + $0xd8] sm:$0xff]  ;;  %vm3554_vm5 = vmpackc.low %vm1589_vm4, %vm1589_vm4 }
  0x20   :  { %213 = vperm.xlu1 %2394, %v119_v33   ;;  %v67_v33 = vld [vmem:[%s3633_s2 + $0x98] sm:$0xff]  ;;  %v157_v48 = vld [vmem:[%s3632_s3 + $0x168] sm:$0xff] }
  0x23   :  { %298 = vperm.xlu0 %2393, %v136_v36   ;;  %v171_v36 = vld [vmem:[%s3632_s3 + $0x1d8] sm:$0xff] }
  0x24   :  { %303 = vperm.xlu1 %2394, %v137_v37   ;;  %v69_v37 = vld [vmem:[%s3633_s2 + $0xa8] sm:$0xff] }
  0x25   :  { %2262 = vmatpush3.bf16.xpose.msk.msra.mxu0 %vm2603_vm1, %v2257_v31  ;;  %v152_v31 = vld [vmem:[%s3632_s3 + $0x140] sm:$0xff] }
  0x26   :  { %2265 = vmatprep.subr.msk.bf16.mxu0 %vm2603_vm1, %v2263_v38 }
  0x27   :  { %218 = vperm.xlu0 %2393, %v120_v39   ;;  %v154_v39 = vld [vmem:[%s3632_s3 + $0x150] sm:$0xff] }
  0x28   :  { %223 = vperm.xlu1 %2394, %v121_v40   ;;  %v155_v40 = vld [vmem:[%s3632_s3 + $0x158] sm:$0xff] }
  0x2b   :  { %308 = vperm.xlu0 %2393, %v138_v43   ;;  %v172_v43 = vld [vmem:[%s3632_s3 + $0x1e0] sm:$0xff] }
  0x2c   :  { %313 = vperm.xlu1 %2394, %v139_v44   ;;  %v173_v44 = vld [vmem:[%s3632_s3 + $0x1e8] sm:$0xff] }
  0x2d   :  { %2268 = vmatpush3.bf16.xpose.msk.msra.mxu0 %vm2603_vm1, %v2263_v38  ;;  %v70_v38 = vld [vmem:[%s3633_s2 + $0xb0] sm:$0xff] }
  0x2e   :  { %2271 = vmatprep.subr.msk.bf16.mxu0 %vm2603_vm1, %v2269_v45 }
  0x2f   :  { %228 = vperm.xlu0 %2393, %v122_v46   ;;  %v74_v46 = vld [vmem:[%s3633_s2 + $0xd0] sm:$0xff] }
  0x30   :  { %233 = vperm.xlu1 %2394, %v123_v47   ;;  %v156_v47 = vld [vmem:[%s3632_s3 + $0x160] sm:$0xff] }
  0x33   :  { %318 = vperm.xlu0 %2393, %v140_v50   ;;  %v76_v50 = vld [vmem:[%s3633_s2 + $0xe0] sm:$0xff] }
  0x34   :  { %323 = vperm.xlu1 %2394, %v141_v51   ;;  %v174_v51 = vld [vmem:[%s3632_s3 + $0x1f0] sm:$0xff] }
  0x35   :  { %2274 = vmatpush3.bf16.xpose.msk.msra.mxu0 %vm2603_vm1, %v2269_v45  ;;  %v73_v45 = vld [vmem:[%s3633_s2 + $0xc8] sm:$0xff] }
  0x36   :  { %2277 = vmatprep.subr.msk.bf16.mxu0 %vm2603_vm1, %v2275_v52 }
  0x37   :  { %238 = vperm.xlu0 %2393, %v124_v53   ;;  %v77_v53 = vld [vmem:[%s3633_s2 + $0xe8] sm:$0xff] }
  0x38   :  { %243 = vperm.xlu1 %2394, %v125_v54   ;;  %v78_v54 = vld [vmem:[%s3633_s2 + $0xf0] sm:$0xff] }
  0x3b   :  { %328 = vperm.xlu0 %2393, %v142_v55   ;;  %v158_v55 = vld [vmem:[%s3632_s3 + $0x170] sm:$0xff] }
  0x3c   :  { %333 = vperm.xlu1 %2394, %v143_v56   ;;  %v159_v56 = vld [vmem:[%s3632_s3 + $0x178] sm:$0xff] }
  0x3d   :  { %2280 = vmatpush3.bf16.xpose.msk.msra.mxu0 %vm2603_vm1, %v2275_v52  ;;  %v175_v52 = vld [vmem:[%s3632_s3 + $0x1f8] sm:$0xff] }
  0x3f   :  { %248 = vperm.xlu0 %2393, %v126_v57   ;;  %v79_v57 = vld [vmem:[%s3633_s2 + $0xf8] sm:$0xff] }
  0x40   :  { %253 = vperm.xlu1 %2394, %v127_v58   ;;  %v80_v58 = vld [vmem:[%s3633_s2 + $0x100] sm:$0xff] }
  0x43   :  { %418 = vperm.xlu0 %2393, %v160_v59   ;;  %v1218_v59 = vld [vmem:[%s3634_s5] sm:$0xff] }
  0x44   :  { %423 = vperm.xlu1 %2394, %v161_v60   ;;  %2084 = vmatmul.mubr.msk.f32.vlgmr.msra.gmra.mrb[0].mxu0 %vm496_vm0, %v49_v61  ;;  %v1219_v60 = vld [vmem:[%s3634_s5 + $0x8] sm:$0xff] }
  0x45   :  { %2086 = vmatprep.mubr.msk.f32.mxu0 %vm496_vm0, %v50_v62  ;;  %v81_v61 = vld [vmem:[%s3633_s2 + $0x108] sm:$0xff]  ;;  %v82_v62 = vld [vmem:[%s3633_s2 + $0x110] sm:$0xff] }
  0x47   :  { %338 = vperm.xlu0 %2393, %v144_v63   ;;  %v1220_v63 = vld [vmem:[%s3634_s5 + $0x10] sm:$0xff] }
  0x48   :  { %343 = vperm.xlu1 %2394, %v145_v0   ;;  %2087 = vmatmul.mubr.msk.f32.gmra.mrb[2].mxu0 %vm496_vm0, %v51_v1  ;;  %v1221_v0 = vld [vmem:[%s3634_s5 + $0x18] sm:$0xff] }
  0x49   :  { %2089 = vmatprep.mubr.msk.f32.mxu0 %vm496_vm0, %v52_v2  ;;  %v83_v1 = vld [vmem:[%s3633_s2 + $0x118] sm:$0xff]  ;;  %v84_v2 = vld [vmem:[%s3633_s2 + $0x120] sm:$0xff] }
  0x4b   :  { %428 = vperm.xlu0 %2393, %v162_v3   ;;  %v1222_v3 = vld [vmem:[%s3634_s5 + $0x20] sm:$0xff] }
  0x4c   :  { %433 = vperm.xlu1 %2394, %v163_v4   ;;  %2090 = vmatmul.mubr.msk.f32.gmra.mrb[4].mxu0 %vm496_vm0, %v53_v5  ;;  %v1223_v4 = vld [vmem:[%s3634_s5 + $0x28] sm:$0xff] }
  0x4d   :  { %2092 = vmatprep.mubr.msk.f32.mxu0 %vm496_vm0, %v54_v6  ;;  %v85_v5 = vld [vmem:[%s3633_s2 + $0x128] sm:$0xff]  ;;  %v86_v6 = vld [vmem:[%s3633_s2 + $0x130] sm:$0xff] }
  0x4f   :  { %348 = vperm.xlu0 %2393, %v146_v7   ;;  %v1224_v7 = vld [vmem:[%s3634_s5 + $0x30] sm:$0xff] }
  0x50   :  { %353 = vperm.xlu1 %2394, %v147_v8   ;;  %2093 = vmatmul.mubr.msk.f32.gmra.mrb[6].mxu0 %vm496_vm0, %v55_v9  ;;  %v1225_v8 = vld [vmem:[%s3634_s5 + $0x38] sm:$0xff] }
  0x51   :  { %2095 = vmatprep.mubr.msk.f32.mxu0 %vm496_vm0, %v56_v10  ;;  %v87_v9 = vld [vmem:[%s3633_s2 + $0x138] sm:$0xff]  ;;  %v88_v10 = vld [vmem:[%s3633_s2 + $0x140] sm:$0xff] }
  0x53   :  { %438 = vperm.xlu0 %2393, %v164_v11   ;;  %v1485_v11 = vld [vmem:[%s3635_s7] sm:$0x1f] }
  0x54   :  { %443 = vperm.xlu1 %2394, %v165_v12   ;;  %2096 = vmatmul.mubr.msk.f32.gmra.mrb[8].mxu0 %vm496_vm0, %v57_v13  ;;  %v1713_v12 = vld [vmem:[%s3636_s8] sm:$0xf]  ;;  %v89_v13 = vld [vmem:[%s3633_s2 + $0x148] sm:$0xff] }
  0x55   :  { %2098 = vmatprep.mubr.msk.f32.mxu0 %vm496_vm0, %v58_v14  ;;  %v90_v14 = vld [vmem:[%s3633_s2 + $0x150] sm:$0xff] }
  0x57   :  { %358 = vperm.xlu0 %2393, %v148_v15   ;;  %v91_v15 = vld [vmem:[%s3633_s2 + $0x158] sm:$0xff] }
  0x58   :  { %363 = vperm.xlu1 %2394, %v149_v16   ;;  %2099 = vmatmul.mubr.msk.f32.gmra.mrb[10].mxu0 %vm496_vm0, %v59_v17  ;;  %v92_v16 = vld [vmem:[%s3633_s2 + $0x160] sm:$0xff]  ;;  %v93_v17 = vld [vmem:[%s3633_s2 + $0x168] sm:$0xff] }
  0x59   :  { %2101 = vmatprep.mubr.msk.f32.mxu0 %vm496_vm0, %v60_v18  ;;  %v94_v18 = vld [vmem:[%s3633_s2 + $0x170] sm:$0xff] }
  0x5b   :  { %448 = vperm.xlu0 %2393, %v166_v19   ;;  %v95_v19 = vld [vmem:[%s3633_s2 + $0x178] sm:$0xff] }
  0x5c   :  { %453 = vperm.xlu1 %2394, %v167_v20   ;;  %2102 = vmatmul.mubr.msk.f32.gmra.mrb[12].mxu0 %vm496_vm0, %v61_v21  ;;  %v96_v20 = vld [vmem:[%s3633_s2 + $0x180] sm:$0xff]  ;;  %v97_v21 = vld [vmem:[%s3633_s2 + $0x188] sm:$0xff] }
  0x5d   :  { %2104 = vmatprep.mubr.msk.f32.mxu0 %vm496_vm0, %v62_v22  ;;  %v98_v22 = vld [vmem:[%s3633_s2 + $0x190] sm:$0xff] }
  0x5f   :  { %368 = vperm.xlu0 %2393, %v150_v23   ;;  %v99_v23 = vld [vmem:[%s3633_s2 + $0x198] sm:$0xff] }
  0x60   :  { %373 = vperm.xlu1 %2394, %v151_v24   ;;  %2105 = vmatmul.mubr.msk.f32.gmra.mrb[14].mxu0 %vm496_vm0, %v63_v25  ;;  %v100_v24 = vld [vmem:[%s3633_s2 + $0x1a0] sm:$0xff]  ;;  %v101_v25 = vld [vmem:[%s3633_s2 + $0x1a8] sm:$0xff] }
  0x61   :  { %2107 = vmatprep.mubr.msk.f32.mxu0 %vm496_vm0, %v64_v26  ;;  %v102_v26 = vld [vmem:[%s3633_s2 + $0x1b0] sm:$0xff] }
  0x63   :  { %458 = vperm.xlu0 %2393, %v168_v27   ;;  %v103_v27 = vld [vmem:[%s3633_s2 + $0x1b8] sm:$0xff] }
  0x64   :  { %463 = vperm.xlu1 %2394, %v169_v28   ;;  %2108 = vmatmul.mubr.msk.f32.gmra.mrb[16].mxu0 %vm496_vm0, %v65_v29  ;;  %v104_v28 = vld [vmem:[%s3633_s2 + $0x1c0] sm:$0xff]  ;;  %v105_v29 = vld [vmem:[%s3633_s2 + $0x1c8] sm:$0xff] }
  0x65   :  { %2110 = vmatprep.mubr.msk.f32.mxu0 %vm496_vm0, %v66_v30  ;;  %v106_v30 = vld [vmem:[%s3633_s2 + $0x1d0] sm:$0xff] }
  0x67   :  { %378 = vperm.xlu0 %2393, %v152_v31   ;;  %v107_v31 = vld [vmem:[%s3633_s2 + $0x1d8] sm:$0xff] }
  0x68   :  { %383 = vperm.xlu1 %2394, %v153_v32   ;;  %2111 = vmatmul.mubr.msk.f32.gmra.mrb[18].mxu0 %vm496_vm0, %v67_v33  ;;  %v108_v32 = vld [vmem:[%s3633_s2 + $0x1e0] sm:$0xff] }
  0x69   :  { %2113 = vmatprep.mubr.msk.f32.mxu0 %vm496_vm0, %v68_v34  ;;  %v109_v34 = vld [vmem:[%s3633_s2 + $0x1e8] sm:$0xff] }
  0x6b   :  { %468 = vperm.xlu0 %2393, %v170_v35  }
  0x6c   :  { %473 = vperm.xlu1 %2394, %v171_v36   ;;  %2114 = vmatmul.mubr.msk.f32.gmra.mrb[20].mxu0 %vm496_vm0, %v69_v37  ;;  %v110_v36 = vld [vmem:[%s3633_s2 + $0x1f0] sm:$0xff]  ;;  %v111_v37 = vld [vmem:[%s3633_s2 + $0x1f8] sm:$0xff] }
  0x6d   :  { %2116 = vmatprep.mubr.msk.f32.mxu0 %vm496_vm0, %v70_v38 }
  0x6f   :  { %388 = vperm.xlu0 %2393, %v154_v39  }
  0x70   :  { %393 = vperm.xlu1 %2394, %v155_v40   ;;  %2117 = vmatmul.mubr.msk.f32.gmra.mrb[22].mxu0 %vm496_vm0, %v71_v41 }
  0x71   :  { %2119 = vmatprep.mubr.msk.f32.mxu0 %vm496_vm0, %v72_v42 }
  0x73   :  { %478 = vperm.xlu0 %2393, %v172_v43  }
  0x74   :  { %483 = vperm.xlu1 %2394, %v173_v44   ;;  %2120 = vmatmul.mubr.msk.f32.gmra.mrb[24].mxu0 %vm496_vm0, %v73_v45 }
  0x75   :  { %2122 = vmatprep.mubr.msk.f32.mxu0 %vm496_vm0, %v74_v46 }
  0x77   :  { %398 = vperm.xlu0 %2393, %v156_v47  }
  0x78   :  { %403 = vperm.xlu1 %2394, %v157_v48   ;;  %2123 = vmatmul.mubr.msk.f32.gmra.mrb[26].mxu0 %vm496_vm0, %v75_v49 }
  0x79   :  { %2125 = vmatprep.mubr.msk.f32.mxu0 %vm496_vm0, %v76_v50 }
  0x7b   :  { %488 = vperm.xlu0 %2393, %v174_v51  }
  0x7c   :  { %493 = vperm.xlu1 %2394, %v175_v52   ;;  %2126 = vmatmul.mubr.msk.f32.gmra.mrb[28].mxu0 %vm496_vm0, %v77_v53  ;;  %v1187_v52 = vld [vmem:[%s3637_s4 + $0x8] sm:$0xff] }
  0x7d   :  { %2128 = vmatprep.mubr.msk.f32.mxu0 %vm496_vm0, %v78_v54  ;;  %1330 = vmatprep.mubr.f32.mxu1 %v1187_v52 }
  0x7f   :  { %408 = vperm.xlu0 %2393, %v158_v55  }
  0x80   :  { %413 = vperm.xlu1 %2394, %v159_v56   ;;  %2129 = vmatmul.mubr.msk.f32.gmra.mrb[30].mxu0 %vm496_vm0, %v79_v57 }
  0x81   :  { %2131 = vmatprep.mubr.msk.f32.mxu0 %vm496_vm0, %v80_v58 }
  0x82   :  { %v3150_v35 = vpop.permute.xlu0 %258 }
  0x83   :  { %1228 = vperm.xlu0 %2393, %v1218_v59   ;;  %v179_v33 = vpop.permute.xlu1 %178 }
  0x84   :  { %1233 = vperm.xlu1 %2394, %v1219_v60   ;;  %2132 = vmatmul.mubr.msk.f32.gmra.mrb[32].mxu0 %vm496_vm0, %v81_v61 }
  0x85   :  { %2134 = vmatprep.mubr.msk.f32.mxu0 %vm496_vm0, %v82_v62 }
  0x86   :  { %v3160_v39 = vpop.permute.xlu0 %263 }
  0x87   :  { %1238 = vperm.xlu0 %2393, %v1220_v63   ;;  %v184_v38 = vpop.permute.xlu1 %183 }
  0x88   :  { %1243 = vperm.xlu1 %2394, %v1221_v0   ;;  %2135 = vmatmul.mubr.msk.f32.gmra.mrb[34].mxu0 %vm496_vm0, %v83_v1 }
  0x89   :  { %2137 = vmatprep.mubr.msk.f32.mxu0 %vm496_vm0, %v84_v2 }
  0x8a   :  { %v3165_v41 = vpop.permute.xlu0 %268 }
  0x8b   :  { %1248 = vperm.xlu0 %2393, %v1222_v3   ;;  %v3163_v40 = vpop.permute.xlu1 %273 }
  0x8c   :  { %1253 = vperm.xlu1 %2394, %v1223_v4   ;;  %2138 = vmatmul.mubr.msk.f32.gmra.mrb[36].mxu0 %vm496_vm0, %v85_v5 }
  0x8d   :  { %2140 = vmatprep.mubr.msk.f32.mxu0 %vm496_vm0, %v86_v6 }
  0x8e   :  { %v189_v43 = vpop.permute.xlu0 %188 }
  0x8f   :  { %1258 = vperm.xlu0 %2393, %v1224_v7   ;;  %v194_v42 = vpop.permute.xlu1 %193 }
  0x90   :  { %1263 = vperm.xlu1 %2394, %v1225_v8   ;;  %2141 = vmatmul.mubr.msk.f32.gmra.mrb[38].mxu0 %vm496_vm0, %v87_v9 }
  0x91   :  { %2143 = vmatprep.mubr.msk.f32.mxu0 %vm496_vm0, %v88_v10 }
  0x92   :  { %v3169_v45 = vpop.permute.xlu0 %278 }
  0x93   :  { %1488 = vperm.xlu0 %2393, %v1485_v11   ;;  %v3167_v44 = vpop.permute.xlu1 %283 }
  0x94   :  { %1716 = vperm.xlu1 %2394, %v1713_v12   ;;  %2144 = vmatmul.mubr.msk.f32.gmra.mrb[40].mxu0 %vm496_vm0, %v89_v13 }
  0x95   :  { %2146 = vmatprep.mubr.msk.f32.mxu0 %vm496_vm0, %v90_v14 }
  0x96   :  { %v199_v47 = vpop.permute.xlu0 %198 }
  0x97   :  { %v204_v46 = vpop.permute.xlu1 %203 }
  0x98   :  { %2147 = vmatmul.mubr.msk.f32.gmra.mrb[42].mxu0 %vm496_vm0, %v91_v15 }
  0x99   :  { %2149 = vmatprep.mubr.msk.f32.mxu0 %vm496_vm0, %v92_v16 }
  0x9a   :  { %v3173_v49 = vpop.permute.xlu0 %288 }
  0x9b   :  { %v3171_v48 = vpop.permute.xlu1 %293 }
  0x9c   :  { %2150 = vmatmul.mubr.msk.f32.gmra.mrb[44].mxu0 %vm496_vm0, %v93_v17 }
  0x9d   :  { %2152 = vmatprep.mubr.msk.f32.mxu0 %vm496_vm0, %v94_v18 }
  0x9e   :  { %v209_v51 = vpop.permute.xlu0 %208 }
  0x9f   :  { %v214_v50 = vpop.permute.xlu1 %213 }
  0xa0   :  { %2153 = vmatmul.mubr.msk.f32.gmra.mrb[46].mxu0 %vm496_vm0, %v95_v19 }
  0xa1   :  { %2155 = vmatprep.mubr.msk.f32.mxu0 %vm496_vm0, %v96_v20 }
  0xa2   :  { %v3180_v54 = vpop.permute.xlu0 %298 }
  0xa3   :  { %v3178_v53 = vpop.permute.xlu1 %303 }
  0xa4   :  { %2156 = vmatmul.mubr.msk.f32.gmra.mrb[48].mxu0 %vm496_vm0, %v97_v21 }
  0xa5   :  { %2158 = vmatprep.mubr.msk.f32.mxu0 %vm496_vm0, %v98_v22 }
  0xa6   :  { %v219_v56 = vpop.permute.xlu0 %218 }
  0xa7   :  { %v224_v55 = vpop.permute.xlu1 %223 }
  0xa8   :  { %2159 = vmatmul.mubr.msk.f32.gmra.mrb[50].mxu0 %vm496_vm0, %v99_v23 }
  0xa9   :  { %2161 = vmatprep.mubr.msk.f32.mxu0 %vm496_vm0, %v100_v24 }
  0xaa   :  { %v3184_v58 = vpop.permute.xlu0 %308 }
  0xab   :  { %v3182_v57 = vpop.permute.xlu1 %313 }
  0xac   :  { %2162 = vmatmul.mubr.msk.f32.gmra.mrb[52].mxu0 %vm496_vm0, %v101_v25 }
  0xad   :  { %2164 = vmatprep.mubr.msk.f32.mxu0 %vm496_vm0, %v102_v26 }
  0xae   :  { %v229_v60 = vpop.permute.xlu0 %228 }
  0xaf   :  { %v234_v59 = vpop.permute.xlu1 %233 }
  0xb0   :  { %2165 = vmatmul.mubr.msk.f32.gmra.mrb[54].mxu0 %vm496_vm0, %v103_v27 }
  0xb1   :  { %2167 = vmatprep.mubr.msk.f32.mxu0 %vm496_vm0, %v104_v28 }
  0xb2   :  { %v3188_v62 = vpop.permute.xlu0 %318 }
  0xb3   :  { %v3186_v61 = vpop.permute.xlu1 %323 }
  0xb4   :  { %2168 = vmatmul.mubr.msk.f32.gmra.mrb[56].mxu0 %vm496_vm0, %v105_v29 }
  0xb5   :  { %2170 = vmatprep.mubr.msk.f32.mxu0 %vm496_vm0, %v106_v30 }
  0xb6   :  { %v3190_v0 = vpop.permute.xlu0 %238 }
  0xb7   :  { %v244_v63 = vpop.permute.xlu1 %243 }
  0xb8   :  { %2171 = vmatmul.mubr.msk.f32.gmra.mrb[58].mxu0 %vm496_vm0, %v107_v31 }
  0xb9   :  { %2173 = vmatprep.mubr.msk.f32.mxu0 %vm496_vm0, %v108_v32 }
  0xba   :  { %v3194_v2 = vpop.permute.xlu0 %328 }
  0xbb   :  { %v3192_v1 = vpop.permute.xlu1 %333 }
  0xbc   :  { %2174 = vmatmul.mubr.msk.f32.gmra.mrb[60].mxu0 %vm496_vm0, %v109_v34 }
  0xbd   :  { %2176 = vmatprep.mubr.msk.f32.mxu0 %vm496_vm0, %v110_v36 }
  0xbe   :  { %v3198_v4 = vpop.permute.xlu0 %248 }
  0xbf   :  { %v3196_v3 = vpop.permute.xlu1 %253 }
  0xc0   :  { %2177 = vmatmul.mubr.msk.f32.gmra.mrb[62].mxu0 %vm496_vm0, %v111_v37 }
  0xc2   :  { %v3202_v10 = vpop.permute.xlu0 %418 }
  0xc3   :  { %v3200_v8 = vpop.permute.xlu1 %423 }
  0xc6   :  { %v3206_v17 = vpop.permute.xlu0 %338 }
  0xc7   :  { %v3204_v15 = vpop.permute.xlu1 %343 }
  0xca   :  { %v3214_v28 = vpop.permute.xlu0 %428 }
  0xcb   :  { %v3212_v26 = vpop.permute.xlu1 %433 }
 0x117   :  { %v2085_v5 = vpop.f32.mrb[0].mxu0 }
 0x118   :  { %v809_v6 = vadd.f32 %v2085_v5, %v184_v38  ;;  %v803_v7 = vpop.f32.mrb[1].mxu0  ;;  %v3224_v38 = vpop.permute.xlu1 %353 }
 0x119   :  { %v804_v9 = vadd.f32 %v803_v7, %v179_v33 }
 0x11a   :  { %2395 = vtanh.f32 %v809_v6 }
 0x11b   :  { %2397 = vtanh.f32 %v804_v9  ;;  %v2088_v11 = vpop.f32.mrb[2].mxu0 }
 0x11c   :  { %v819_v12 = vadd.f32 %v2088_v11, %v194_v42  ;;  %v813_v13 = vpop.f32.mrb[3].mxu0  ;;  %v3238_v11 = vpop.permute.xlu1 %443 }
 0x11d   :  { %v814_v14 = vadd.f32 %v813_v13, %v189_v43 }
 0x11e   :  { %2399 = vtanh.f32 %v819_v12 }
 0x11f   :  { %2401 = vtanh.f32 %v814_v14  ;;  %v2091_v16 = vpop.f32.mrb[4].mxu0 }
 0x120   :  { %v829_v18 = vadd.f32 %v2091_v16, %v204_v46  ;;  %v823_v19 = vpop.f32.mrb[5].mxu0  ;;  %v3228_v46 = vpop.permute.xlu0 %348 }
 0x121   :  { %v824_v20 = vadd.f32 %v823_v19, %v199_v47 }
 0x122   :  { %2403 = vtanh.f32 %v829_v18 }
 0x123   :  { %2405 = vtanh.f32 %v824_v20  ;;  %v2094_v21 = vpop.f32.mrb[6].mxu0  ;;  %v3253_v20 = vpop.permute.xlu1 %363 }
 0x124   :  { %v3208_v22 = vpop.eup %2395  ;;  %v839_v23 = vadd.f32 %v2094_v21, %v214_v50  ;;  %v833_v24 = vpop.f32.mrb[7].mxu0 }
 0x125   :  { %v3210_v25 = vpop.eup %2397  ;;  %v834_v27 = vadd.f32 %v833_v24, %v209_v51  ;;  %v3241_v12 = vpop.permute.xlu0 %438 }
 0x126   :  { %2407 = vtanh.f32 %v839_v23  ;;  %v2283_v29 = vpack.c.bf16 %v3208_v22, %v3210_v25 }
 0x127   :  { %2409 = vtanh.f32 %v834_v27  ;;  %v2097_v30 = vpop.f32.mrb[8].mxu0 }
 0x128   :  { %v3218_v31 = vpop.eup %2399  ;;  %v849_v32 = vadd.f32 %v2097_v30, %v224_v55  ;;  %v843_v33 = vpop.f32.mrb[9].mxu0 }
 0x129   :  { %v3220_v34 = vpop.eup %2401  ;;  %v844_v36 = vadd.f32 %v843_v33, %v219_v56  ;;  %v3257_v24 = vpop.permute.xlu0 %358 }
 0x12a   :  { %2411 = vtanh.f32 %v849_v32  ;;  %v2287_v37 = vpack.c.bf16 %v3218_v31, %v3220_v34 }
 0x12b   :  { %2413 = vtanh.f32 %v844_v36  ;;  %v2100_v42 = vpop.f32.mrb[10].mxu0 }
 0x12c   :  { %v3226_v43 = vpop.eup %2403  ;;  %v859_v47 = vadd.f32 %v2100_v42, %v234_v59  ;;  %v853_v50 = vpop.f32.mrb[11].mxu0 }
 0x12d   :  { %v3230_v51 = vpop.eup %2405  ;;  %v854_v52 = vadd.f32 %v853_v50, %v229_v60 }
 0x12e   :  { %2415 = vtanh.f32 %v859_v47  ;;  %v2291_v55 = vpack.c.bf16 %v3226_v43, %v3230_v51 }
 0x12f   :  { %2417 = vtanh.f32 %v854_v52  ;;  %v2103_v56 = vpop.f32.mrb[12].mxu0  ;;  %v3270_v52 = vpop.permute.xlu1 %453 }
 0x130   :  { %v3234_v5 = vpop.eup %2407  ;;  %v869_v6 = vadd.f32 %v2103_v56, %v244_v63  ;;  %v863_v7 = vpop.f32.mrb[13].mxu0 }
 0x131   :  { %v3236_v9 = vpop.eup %2409  ;;  %v864_v59 = vadd.f32 %v863_v7, %v3190_v0  ;;  %v3273_v56 = vpop.permute.xlu0 %448 }
 0x132   :  { %2419 = vtanh.f32 %v869_v6  ;;  %v2295_v60 = vpack.c.bf16 %v3234_v5, %v3236_v9 }
 0x133   :  { %2421 = vtanh.f32 %v864_v59  ;;  %v2106_v13 = vpop.f32.mrb[14].mxu0 }
 0x134   :  { %v3245_v14 = vpop.eup %2411  ;;  %v879_v16 = vadd.f32 %v2106_v13, %v3196_v3  ;;  %v873_v63 = vpop.f32.mrb[15].mxu0 }
 0x135   :  { %v3248_v18 = vpop.eup %2413  ;;  %v874_v19 = vadd.f32 %v873_v63, %v3198_v4  ;;  %v3285_v63 = vpop.permute.xlu1 %373 }
 0x136   :  { %2423 = vtanh.f32 %v879_v16  ;;  %v2299_v0 = vpack.c.bf16 %v3245_v14, %v3248_v18 }
 0x137   :  { %2425 = vtanh.f32 %v874_v19  ;;  %v2109_v21 = vpop.f32.mrb[16].mxu0 }
 0x138   :  { %v3255_v23 = vpop.eup %2415  ;;  %v889_v27 = vadd.f32 %v2109_v21, %v3160_v39  ;;  %v883_v3 = vpop.f32.mrb[17].mxu0 }
 0x139   :  { %v3260_v30 = vpop.eup %2417  ;;  %v884_v32 = vadd.f32 %v883_v3, %v3150_v35 }
 0x13a   :  { %2427 = vtanh.f32 %v889_v27  ;;  %v2303_v4 = vpack.c.bf16 %v3255_v23, %v3260_v30  ;;  %v3287_v27 = vpop.permute.xlu0 %368 }
 0x13b   :  { %2429 = vtanh.f32 %v884_v32  ;;  %v2112_v33 = vpop.f32.mrb[18].mxu0 }
 0x13c   :  { %v3265_v36 = vpop.eup %2419  ;;  %v899_v42 = vadd.f32 %v2112_v33, %v3163_v40  ;;  %v893_v47 = vpop.f32.mrb[19].mxu0 }
 0x13d   :  { %v3268_v50 = vpop.eup %2421  ;;  %v894_v39 = vadd.f32 %v893_v47, %v3165_v41 }
 0x13e   :  { %2431 = vtanh.f32 %v899_v42  ;;  %v2307_v35 = vpack.c.bf16 %v3265_v36, %v3268_v50  ;;  %v1186_v36 = vld [vmem:[%s3637_s4] sm:$0xff]  ;;  %v1191_v50 = vld [vmem:[%s3637_s4 + $0x28] sm:$0xff] }
 0x13f   :  { %2433 = vtanh.f32 %v894_v39  ;;  %v2115_v6 = vpop.f32.mrb[20].mxu0 }
 0x140   :  { %v3277_v7 = vpop.eup %2423  ;;  %v909_v59 = vadd.f32 %v2115_v6, %v3167_v44  ;;  %v903_v40 = vpop.f32.mrb[21].mxu0 }
 0x141   :  { %v3280_v13 = vpop.eup %2425  ;;  %v904_v16 = vadd.f32 %v903_v40, %v3169_v45  ;;  %v3292_v40 = vpop.permute.xlu1 %463 }
 0x142   :  { %2435 = vtanh.f32 %v909_v59  ;;  %v2311_v41 = vpack.c.bf16 %v3277_v7, %v3280_v13 }
 0x143   :  { %2437 = vtanh.f32 %v904_v16  ;;  %v2118_v19 = vpop.f32.mrb[22].mxu0 }
 0x144   :  { %v2428_v21 = vpop.eup %2427  ;;  %v919_v3 = vadd.f32 %v2118_v19, %v3171_v48  ;;  %v913_v32 = vpop.f32.mrb[23].mxu0 }
 0x145   :  { %v2430_v44 = vpop.eup %2429  ;;  %v914_v33 = vadd.f32 %v913_v32, %v3173_v49  ;;  %v3298_v48 = vpop.permute.xlu0 %458 }
 0x146   :  { %2439 = vtanh.f32 %v919_v3  ;;  %v2281_v42 = vpack.c.bf16 %v2428_v21, %v2430_v44  ;;  %v3305_v22 = vpop.permute.xlu1 %383 }
 0x147   :  { %2441 = vtanh.f32 %v914_v33  ;;  %v2121_v45 = vpop.f32.mrb[24].mxu0 }
 0x148   :  { %v2432_v47 = vpop.eup %2431  ;;  %v929_v39 = vadd.f32 %v2121_v45, %v3178_v53  ;;  %v923_v6 = vpop.f32.mrb[25].mxu0  ;;  %2282 = vmatprep.subr.bf16.mxu1 %v2281_v42 }
 0x149   :  { %v2434_v59 = vpop.eup %2433  ;;  %v924_v16 = vadd.f32 %v923_v6, %v3180_v54  ;;  %2284 = vmatpush3.bf16.msra.mxu1 %v2283_v29  ;;  %v3307_v33 = vpop.permute.xlu0 %378 }
 0x14a   :  { %2443 = vtanh.f32 %v929_v39  ;;  %v2285_v49 = vpack.c.bf16 %v2432_v47, %v2434_v59 }
 0x14b   :  { %2445 = vtanh.f32 %v924_v16  ;;  %v2124_v19 = vpop.f32.mrb[26].mxu0 }
 0x14c   :  { %v2436_v21 = vpop.eup %2435  ;;  %v939_v53 = vadd.f32 %v2124_v19, %v3182_v57  ;;  %v933_v3 = vpop.f32.mrb[27].mxu0  ;;  %2286 = vmatprep.subr.bf16.mxu1 %v2285_v49 }
 0x14d   :  { %v2438_v32 = vpop.eup %2437  ;;  %v934_v44 = vadd.f32 %v933_v3, %v3184_v58  ;;  %2288 = vmatpush3.bf16.msra.mxu1 %v2287_v37 }
 0x14e   :  { %2447 = vtanh.f32 %v939_v53  ;;  %v2289_v54 = vpack.c.bf16 %v2436_v21, %v2438_v32 }
 0x14f   :  { %2449 = vtanh.f32 %v934_v44  ;;  %v2127_v25 = vpop.f32.mrb[28].mxu0 }
 0x150   :  { %v2440_v29 = vpop.eup %2439  ;;  %v949_v57 = vadd.f32 %v2127_v25, %v3186_v61  ;;  %v943_v42 = vpop.f32.mrb[29].mxu0  ;;  %2290 = vmatprep.subr.bf16.mxu1 %v2289_v54 }
 0x151   :  { %v2442_v45 = vpop.eup %2441  ;;  %v944_v58 = vadd.f32 %v943_v42, %v3188_v62  ;;  %2292 = vmatpush3.bf16.msra.mxu1 %v2291_v55  ;;  %v3315_v61 = vpop.permute.xlu1 %473 }
 0x152   :  { %2451 = vtanh.f32 %v949_v57  ;;  %v2293_v31 = vpack.c.bf16 %v2440_v29, %v2442_v45  ;;  %v3321_v62 = vpop.permute.xlu0 %468 }
 0x153   :  { %2453 = vtanh.f32 %v944_v58  ;;  %v2130_v34 = vpop.f32.mrb[30].mxu0 }
 0x154   :  { %v2444_v37 = vpop.eup %2443  ;;  %v959_v47 = vadd.f32 %v2130_v34, %v3192_v1  ;;  %v953_v39 = vpop.f32.mrb[31].mxu0  ;;  %2294 = vmatprep.subr.bf16.mxu1 %v2293_v31  ;;  %v1190_v31 = vld [vmem:[%s3637_s4 + $0x20] sm:$0xff]  ;;  %v1195_v34 = vld [vmem:[%s3637_s4 + $0x48] sm:$0xff] }
 0x155   :  { %v2446_v6 = vpop.eup %2445  ;;  %v954_v59 = vadd.f32 %v953_v39, %v3194_v2  ;;  %2296 = vmatpush3.bf16.msra.mxu1 %v2295_v60  ;;  %v394_v5 = vpop.permute.xlu1 %393 }
 0x156   :  { %2455 = vtanh.f32 %v959_v47  ;;  %v2297_v43 = vpack.c.bf16 %v2444_v37, %v2446_v6  ;;  %v389_v21 = vpop.permute.xlu0 %388 }
 0x157   :  { %2457 = vtanh.f32 %v954_v59  ;;  %v2133_v51 = vpop.f32.mrb[32].mxu0 }
 0x158   :  { %v2448_v55 = vpop.eup %2447  ;;  %v969_v1 = vadd.f32 %v2133_v51, %v3204_v15  ;;  %v963_v16 = vpop.f32.mrb[33].mxu0  ;;  %2298 = vmatprep.subr.bf16.mxu1 %v2297_v43  ;;  %v1194_v51 = vld [vmem:[%s3637_s4 + $0x40] sm:$0xff] }
 0x159   :  { %v2450_v49 = vpop.eup %2449  ;;  %v964_v19 = vadd.f32 %v963_v16, %v3206_v17  ;;  %2300 = vmatpush3.bf16.msra.mxu1 %v2299_v0 }
 0x15a   :  { %2459 = vtanh.f32 %v969_v1  ;;  %v2301_v2 = vpack.c.bf16 %v2448_v55, %v2450_v49  ;;  %v1199_v1 = vld [vmem:[%s3637_s4 + $0x68] sm:$0xff] }
 0x15b   :  { %2461 = vtanh.f32 %v964_v19  ;;  %v2136_v9 = vpop.f32.mrb[34].mxu0 }
 0x15c   :  { %v2452_v60 = vpop.eup %2451  ;;  %v979_v53 = vadd.f32 %v2136_v9, %v3224_v38  ;;  %v973_v3 = vpop.f32.mrb[35].mxu0  ;;  %2302 = vmatprep.subr.bf16.mxu1 %v2301_v2 }
 0x15d   :  { %v2454_v15 = vpop.eup %2453  ;;  %v974_v32 = vadd.f32 %v973_v3, %v3228_v46  ;;  %2304 = vmatpush3.bf16.msra.mxu1 %v2303_v4  ;;  %v3334_v38 = vpop.permute.xlu1 %483 }
 0x15e   :  { %2463 = vtanh.f32 %v979_v53  ;;  %v2305_v17 = vpack.c.bf16 %v2452_v60, %v2454_v15  ;;  %v3340_v46 = vpop.permute.xlu0 %478  ;;  %v1203_v53 = vld [vmem:[%s3637_s4 + $0x88] sm:$0xff] }
 0x15f   :  { %2465 = vtanh.f32 %v974_v32  ;;  %v2139_v14 = vpop.f32.mrb[36].mxu0 }
 0x160   :  { %v2456_v18 = vpop.eup %2455  ;;  %v989_v0 = vadd.f32 %v2139_v14, %v3253_v20  ;;  %v983_v44 = vpop.f32.mrb[37].mxu0  ;;  %2306 = vmatprep.subr.bf16.mxu1 %v2305_v17 }
 0x161   :  { %v2458_v54 = vpop.eup %2457  ;;  %v984_v25 = vadd.f32 %v983_v44, %v3257_v24  ;;  %2308 = vmatpush3.bf16.msra.mxu1 %v2307_v35 }
 0x162   :  { %2467 = vtanh.f32 %v989_v0  ;;  %v2309_v23 = vpack.c.bf16 %v2456_v18, %v2458_v54  ;;  %v399_v45 = vpop.permute.xlu0 %398 }
 0x163   :  { %2469 = vtanh.f32 %v984_v25  ;;  %v2142_v30 = vpop.f32.mrb[38].mxu0  ;;  %v1202_v25 = vld [vmem:[%s3637_s4 + $0x80] sm:$0xff] }
 0x164   :  { %v3342_v4 = vpop.eup %2459  ;;  %v999_v20 = vadd.f32 %v2142_v30, %v3285_v63  ;;  %v993_v29 = vpop.f32.mrb[39].mxu0  ;;  %2310 = vmatprep.subr.bf16.mxu1 %v2309_v23  ;;  %v1207_v23 = vld [vmem:[%s3637_s4 + $0xa8] sm:$0xff] }
 0x165   :  { %v3345_v57 = vpop.eup %2461  ;;  %v994_v24 = vadd.f32 %v993_v29, %v3287_v27  ;;  %2312 = vmatpush3.bf16.msra.mxu1 %v2311_v41  ;;  %v404_v63 = vpop.permute.xlu1 %403 }
 0x166   :  { %2471 = vtanh.f32 %v999_v20  ;;  %v2315_v35 = vpack.c.bf16 %v3342_v4, %v3345_v57  ;;  %v3382_v55 = vpop.permute.xlu0 %488 }
 0x167   :  { %2473 = vtanh.f32 %v994_v24  ;;  %v2145_v42 = vpop.f32.mrb[40].mxu0 }
 0x168   :  { %v3359_v27 = vpop.eup %2463  ;;  %v1009_v7 = vadd.f32 %v2145_v42, %v3305_v22  ;;  %v1003_v13 = vpop.f32.mrb[41].mxu0  ;;  %1331 = vmatmul.mubr.f32.vlgmr.msra.gmra.mrb[0].mxu1 %v1186_v36  ;;  %v1206_v42 = vld [vmem:[%s3637_s4 + $0xa0] sm:$0xff] }
 0x169   :  { %v3362_v41 = vpop.eup %2465  ;;  %v1004_v58 = vadd.f32 %v1003_v13, %v3307_v33  ;;  %1335 = vmatprep.mubr.f32.mxu1 %v1191_v50  ;;  %v3377_v59 = vpop.permute.xlu1 %493 }
 0x16a   :  { %2475 = vtanh.f32 %v1009_v7  ;;  %v2319_v37 = vpack.c.bf16 %v3359_v27, %v3362_v41  ;;  %v409_v14 = vpop.permute.xlu0 %408 }
 0x16b   :  { %2477 = vtanh.f32 %v1004_v58  ;;  %v2148_v22 = vpop.f32.mrb[42].mxu0 }
 0x16c   :  { %v3373_v47 = vpop.eup %2467  ;;  %v1019_v39 = vadd.f32 %v2148_v22, %v394_v5  ;;  %v1013_v6 = vpop.f32.mrb[43].mxu0  ;;  %1336 = vmatmul.mubr.f32.gmra.mrb[2].mxu1 %v1190_v31  ;;  %v1210_v22 = vld [vmem:[%s3637_s4 + $0xc0] sm:$0xff] }
 0x16d   :  { %v3375_v33 = vpop.eup %2469  ;;  %v1014_v43 = vadd.f32 %v1013_v6, %v389_v21  ;;  %1340 = vmatprep.mubr.f32.mxu1 %v1195_v34  ;;  %v1198_v21 = vld [vmem:[%s3637_s4 + $0x60] sm:$0xff]  ;;  %v414_v15 = vpop.permute.xlu1 %413 }
 0x16e   :  { %2479 = vtanh.f32 %v1019_v39  ;;  %v2323_v16 = vpack.c.bf16 %v3373_v47, %v3375_v33  ;;  %v1215_v39 = vld [vmem:[%s3637_s4 + $0xe8] sm:$0xff] }
 0x16f   :  { %2481 = vtanh.f32 %v1014_v43  ;;  %v2151_v49 = vpop.f32.mrb[44].mxu0 }
 0x170   :  { %v3389_v19 = vpop.eup %2471  ;;  %v1029_v2 = vadd.f32 %v2151_v49, %v404_v63  ;;  %v1023_v5 = vpop.f32.mrb[45].mxu0  ;;  %1341 = vmatmul.mubr.f32.gmra.mrb[4].mxu1 %v1194_v51 }
 0x171   :  { %v3391_v9 = vpop.eup %2473  ;;  %v1024_v60 = vadd.f32 %v1023_v5, %v399_v45  ;;  %1345 = vmatprep.mubr.f32.mxu1 %v1199_v1  ;;  %v1211_v45 = vld [vmem:[%s3637_s4 + $0xc8] sm:$0xff] }
 0x172   :  { %2483 = vtanh.f32 %v1029_v2  ;;  %v2327_v3 = vpack.c.bf16 %v3389_v19, %v3391_v9  ;;  %v1214_v2 = vld [vmem:[%s3637_s4 + $0xe0] sm:$0xff] }
 0x173   :  { %2485 = vtanh.f32 %v1024_v60  ;;  %v2154_v32 = vpop.f32.mrb[46].mxu0  ;;  %v1189_v60 = vld [vmem:[%s3637_s4 + $0x18] sm:$0xff] }
 0x174   :  { %v3401_v17 = vpop.eup %2475  ;;  %v1039_v18 = vadd.f32 %v2154_v32, %v414_v15  ;;  %v1033_v0 = vpop.f32.mrb[47].mxu0  ;;  %1346 = vmatmul.mubr.f32.gmra.mrb[6].mxu1 %v1198_v21 }
 0x175   :  { %v3403_v44 = vpop.eup %2477  ;;  %v1034_v54 = vadd.f32 %v1033_v0, %v409_v14  ;;  %1350 = vmatprep.mubr.f32.mxu1 %v1203_v53 }
 0x176   :  { %2487 = vtanh.f32 %v1039_v18  ;;  %v2331_v30 = vpack.c.bf16 %v3401_v17, %v3403_v44  ;;  %v1188_v17 = vld [vmem:[%s3637_s4 + $0x10] sm:$0xff]  ;;  %v1193_v44 = vld [vmem:[%s3637_s4 + $0x38] sm:$0xff] }
 0x177   :  { %2489 = vtanh.f32 %v1034_v54  ;;  %v2157_v20 = vpop.f32.mrb[48].mxu0 }
 0x178   :  { %v3413_v29 = vpop.eup %2479  ;;  %v1049_v24 = vadd.f32 %v2157_v20, %v3200_v8  ;;  %v1043_v36 = vpop.f32.mrb[49].mxu0  ;;  %1351 = vmatmul.mubr.f32.gmra.mrb[8].mxu1 %v1202_v25 }
 0x179   :  { %v3416_v50 = vpop.eup %2481  ;;  %v1044_v63 = vadd.f32 %v1043_v36, %v3202_v10  ;;  %1355 = vmatprep.mubr.f32.mxu1 %v1207_v23 }
 0x17a   :  { %2491 = vtanh.f32 %v1049_v24  ;;  %v2335_v7 = vpack.c.bf16 %v3413_v29, %v3416_v50  ;;  %v1197_v29 = vld [vmem:[%s3637_s4 + $0x58] sm:$0xff]  ;;  %v1196_v50 = vld [vmem:[%s3637_s4 + $0x50] sm:$0xff] }
 0x17b   :  { %2493 = vtanh.f32 %v1044_v63  ;;  %v2160_v8 = vpop.f32.mrb[50].mxu0 }
 0x17c   :  { %v3427_v13 = vpop.eup %2483  ;;  %v1059_v58 = vadd.f32 %v2160_v8, %v3212_v26  ;;  %v1053_v10 = vpop.f32.mrb[51].mxu0  ;;  %1356 = vmatmul.mubr.f32.gmra.mrb[10].mxu1 %v1206_v42 }
 0x17d   :  { %v3430_v31 = vpop.eup %2485  ;;  %v1054_v34 = vadd.f32 %v1053_v10, %v3214_v28  ;;  %1360 = vmatprep.mubr.f32.mxu1 %v1211_v45 }
 0x17e   :  { %2495 = vtanh.f32 %v1059_v58  ;;  %v2339_v6 = vpack.c.bf16 %v3427_v13, %v3430_v31  ;;  %v1200_v13 = vld [vmem:[%s3637_s4 + $0x70] sm:$0xff]  ;;  %v1205_v31 = vld [vmem:[%s3637_s4 + $0x98] sm:$0xff] }
 0x17f   :  { %2497 = vtanh.f32 %v1054_v34  ;;  %v2163_v26 = vpop.f32.mrb[52].mxu0 }
 0x180   :  { %v3441_v43 = vpop.eup %2487  ;;  %v1069_v51 = vadd.f32 %v2163_v26, %v3238_v11  ;;  %v1063_v28 = vpop.f32.mrb[53].mxu0  ;;  %1361 = vmatmul.mubr.f32.gmra.mrb[12].mxu1 %v1210_v22  ;;  %v1204_v22 = vld [vmem:[%s3637_s4 + $0x90] sm:$0xff]  ;;  %v1213_v26 = vld [vmem:[%s3637_s4 + $0xd8] sm:$0xff] }
 0x181   :  { %v3444_v1 = vpop.eup %2489  ;;  %v1064_v49 = vadd.f32 %v1063_v28, %v3241_v12  ;;  %1365 = vmatprep.mubr.f32.mxu1 %v1215_v39  ;;  %v1209_v39 = vld [vmem:[%s3637_s4 + $0xb8] sm:$0xff]  ;;  %v1216_v28 = vld [vmem:[%s3637_s4 + $0xf0] sm:$0xff] }
 0x182   :  { %2499 = vtanh.f32 %v1069_v51  ;;  %v2343_v5 = vpack.c.bf16 %v3441_v43, %v3444_v1  ;;  %v1212_v43 = vld [vmem:[%s3637_s4 + $0xd0] sm:$0xff]  ;;  %v1217_v51 = vld [vmem:[%s3637_s4 + $0xf8] sm:$0xff]  ;;  %v2542_v1 = vmov 0.0|0.0  }
 0x183   :  { %2501 = vtanh.f32 %v1064_v49  ;;  %v2166_v11 = vpop.f32.mrb[54].mxu0  ;;  %v2544_v49 = vmov 0.0  }
 0x184   :  { %v2492_v21 = vpop.eup %2491  ;;  %v1079_v53 = vadd.f32 %v2166_v11, %v3270_v52  ;;  %v1073_v15 = vpop.f32.mrb[55].mxu0  ;;  %1366 = vmatmul.mubr.f32.gmra.mrb[14].mxu1 %v1214_v2 }
 0x185   :  { %v2494_v12 = vpop.eup %2493  ;;  %v1074_v32 = vadd.f32 %v1073_v15, %v3273_v56  ;;  %1435 = vmatprep.mubr.f32.mxu1 %v1189_v60 }
 0x186   :  { %2503 = vtanh.f32 %v1079_v53  ;;  %v2313_v14 = vpack.c.bf16 %v2492_v21, %v2494_v12 }
 0x187   :  { %2505 = vtanh.f32 %v1074_v32  ;;  %v2169_v18 = vpop.f32.mrb[56].mxu0 }
 0x188   :  { %v2496_v0 = vpop.eup %2495  ;;  %v1089_v54 = vadd.f32 %v2169_v18, %v3292_v40  ;;  %v1083_v25 = vpop.f32.mrb[57].mxu0  ;;  %2314 = vmatprep.subr.bf16.mxu1 %v2313_v14 }
 0x189   :  { %v2498_v23 = vpop.eup %2497  ;;  %v1084_v20 = vadd.f32 %v1083_v25, %v3298_v48  ;;  %2316 = vmatpush3.bf16.msra.mxu1 %v2315_v35 }
 0x18a   :  { %2507 = vtanh.f32 %v1089_v54  ;;  %v2317_v52 = vpack.c.bf16 %v2496_v0, %v2498_v23 }
 0x18b   :  { %2509 = vtanh.f32 %v1084_v20  ;;  %v2172_v56 = vpop.f32.mrb[58].mxu0 }
 0x18c   :  { %v2500_v24 = vpop.eup %2499  ;;  %v1099_v36 = vadd.f32 %v2172_v56, %v3315_v61  ;;  %v1093_v63 = vpop.f32.mrb[59].mxu0  ;;  %2318 = vmatprep.subr.bf16.mxu1 %v2317_v52 }
 0x18d   :  { %v2502_v42 = vpop.eup %2501  ;;  %v1094_v40 = vadd.f32 %v1093_v63, %v3321_v62  ;;  %2320 = vmatpush3.bf16.msra.mxu1 %v2319_v37 }
 0x18e   :  { %2511 = vtanh.f32 %v1099_v36  ;;  %v2321_v48 = vpack.c.bf16 %v2500_v24, %v2502_v42 }
 0x18f   :  { %2513 = vtanh.f32 %v1094_v40  ;;  %v2175_v4 = vpop.f32.mrb[60].mxu0 }
 0x190   :  { %v2504_v57 = vpop.eup %2503  ;;  %v1109_v35 = vadd.f32 %v2175_v4, %v3334_v38  ;;  %v1103_v45 = vpop.f32.mrb[61].mxu0  ;;  %2322 = vmatprep.subr.bf16.mxu1 %v2321_v48 }
 0x191   :  { %v2506_v8 = vpop.eup %2505  ;;  %v1104_v61 = vadd.f32 %v1103_v45, %v3340_v46  ;;  %2324 = vmatpush3.bf16.msra.mxu1 %v2323_v16 }
 0x192   :  { %2515 = vtanh.f32 %v1109_v35  ;;  %v2325_v62 = vpack.c.bf16 %v2504_v57, %v2506_v8  ;;  %v1229_v57 = vpop.permute.xlu0 %1228 }
 0x193   :  { %2517 = vtanh.f32 %v1104_v61  ;;  %v2178_v27 = vpop.f32.mrb[62].mxu0 }
 0x194   :  { %v2508_v41 = vpop.eup %2507  ;;  %v1119_v37 = vadd.f32 %v2178_v27, %v3377_v59  ;;  %v1113_v58 = vpop.f32.mrb[63].mxu0  ;;  %2326 = vmatprep.subr.bf16.mxu1 %v2325_v62 }
 0x195   :  { %v2510_v10 = vpop.eup %2509  ;;  %v1114_v38 = vadd.f32 %v1113_v58, %v3382_v55  ;;  %2328 = vmatpush3.bf16.msra.mxu1 %v2327_v3  ;;  %v1234_v27 = vpop.permute.xlu1 %1233 }
 0x196   :  { %2519 = vtanh.f32 %v1119_v37  ;;  %v2329_v46 = vpack.c.bf16 %v2508_v41, %v2510_v10 }
 0x197   :  { %2521 = vtanh.f32 %v1114_v38 }
 0x198   :  { %v2512_v47 = vpop.eup %2511  ;;  %2330 = vmatprep.subr.bf16.mxu1 %v2329_v46  ;;  %v1239_v46 = vpop.permute.xlu0 %1238 }
 0x199   :  { %v2514_v33 = vpop.eup %2513  ;;  %2332 = vmatpush3.bf16.msra.mxu1 %v2331_v30  ;;  %v1192_v30 = vld [vmem:[%s3637_s4 + $0x30] sm:$0xff] }
 0x19a   :  { %v2333_v59 = vpack.c.bf16 %v2512_v47, %v2514_v33 }
 0x19c   :  { %v2516_v16 = vpop.eup %2515  ;;  %2334 = vmatprep.subr.bf16.mxu1 %v2333_v59 }
 0x19d   :  { %v2518_v34 = vpop.eup %2517  ;;  %2336 = vmatpush3.bf16.msra.mxu1 %v2335_v7  ;;  %v1201_v7 = vld [vmem:[%s3637_s4 + $0x78] sm:$0xff] }
 0x19e   :  { %v2337_v55 = vpack.c.bf16 %v2516_v16, %v2518_v34 }
 0x1a0   :  { %v2520_v19 = vpop.eup %2519  ;;  %2338 = vmatprep.subr.bf16.mxu1 %v2337_v55  ;;  %v1244_v55 = vpop.permute.xlu1 %1243 }
 0x1a1   :  { %v2522_v9 = vpop.eup %2521  ;;  %2340 = vmatpush3.bf16.msra.mxu1 %v2339_v6  ;;  %v1208_v6 = vld [vmem:[%s3637_s4 + $0xb0] sm:$0xff] }
 0x1a2   :  { %v2341_v3 = vpack.c.bf16 %v2520_v19, %v2522_v9 }
 0x1a4   :  { %2342 = vmatprep.subr.bf16.mxu1 %v2341_v3 }
 0x1a5   :  { %2344 = vmatpush3.bf16.msra.mxu1 %v2343_v5 }
 0x1a6   :  { %2345 = vmatprep.subr.bf16.mxu1 %v2542_v1 }
 0x1a8   :  { %1436 = vmatmul.mubr.f32.vlgmr.msra.gmra.mrb[16].mxu1 %v1188_v17 }
 0x1a9   :  { %1440 = vmatprep.mubr.f32.mxu1 %v1193_v44 }
 0x1ac   :  { %1441 = vmatmul.mubr.f32.gmra.mrb[18].mxu1 %v1192_v30  ;;  %v1249_v30 = vpop.permute.xlu0 %1248 }
 0x1ad   :  { %1445 = vmatprep.mubr.f32.mxu1 %v1197_v29 }
 0x1b0   :  { %1446 = vmatmul.mubr.f32.gmra.mrb[20].mxu1 %v1196_v50 }
 0x1b1   :  { %1450 = vmatprep.mubr.f32.mxu1 %v1201_v7 }
 0x1b4   :  { %1451 = vmatmul.mubr.f32.gmra.mrb[22].mxu1 %v1200_v13 }
 0x1b5   :  { %1455 = vmatprep.mubr.f32.mxu1 %v1205_v31 }
 0x1b8   :  { %1456 = vmatmul.mubr.f32.gmra.mrb[24].mxu1 %v1204_v22 }
 0x1b9   :  { %1460 = vmatprep.mubr.f32.mxu1 %v1209_v39 }
 0x1bc   :  { %1461 = vmatmul.mubr.f32.gmra.mrb[26].mxu1 %v1208_v6  ;;  %v1254_v6 = vpop.permute.xlu1 %1253 }
 0x1bd   :  { %1465 = vmatprep.mubr.f32.mxu1 %v1213_v26 }
 0x1c0   :  { %1466 = vmatmul.mubr.f32.gmra.mrb[28].mxu1 %v1212_v43 }
 0x1c1   :  { %1470 = vmatprep.mubr.f32.mxu1 %v1217_v51 }
 0x1c4   :  { %1471 = vmatmul.mubr.f32.gmra.mrb[30].mxu1 %v1216_v28 }
 0x1c5   :  { %2195 = vmatprep.mubr.msk.f32.mxu1 %vm2543_vm2, %v2544_v49 }
 0x23b   :  { %v1945_v2 = vpop.f32.mrb[0].mxu1 }
 0x23c   :  { %v1946_v5 = vpop.f32.mrb[1].mxu1 }
 0x23d   :  { %v1947_v60 = vadd.f32 %v1946_v5, %v1945_v2 }
 0x23f   :  { %v1948_v11 = vpop.f32.mrb[2].mxu1  ;;  %v1333_v45 = vadd.f32 %v1947_v60, %v1229_v57  ;;  %v1259_v60 = vpop.permute.xlu0 %1258 }
 0x240   :  { %v1949_v21 = vpop.f32.mrb[3].mxu1 }
 0x241   :  { %v1950_v53 = vadd.f32 %v1949_v21, %v1948_v11 }
 0x243   :  { %v1951_v15 = vpop.f32.mrb[4].mxu1  ;;  %v1338_v37 = vadd.f32 %v1950_v53, %v1234_v27  ;;  %v1578_v27 = vld [vmem:[%s3639_s1 + $0x28] sm:$0xff] }
 0x244   :  { %v1952_v12 = vpop.f32.mrb[5].mxu1 }
 0x245   :  { %v1953_v32 = vadd.f32 %v1952_v12, %v1951_v15 }
 0x247   :  { %v1954_v14 = vpop.f32.mrb[6].mxu1  ;;  %v1343_v33 = vadd.f32 %v1953_v32, %v1239_v46  ;;  %v1582_v46 = vld [vmem:[%s3639_s1 + $0x48] sm:$0xff] }
 0x248   :  { %v1955_v18 = vpop.f32.mrb[7].mxu1 }
 0x249   :  { %v1956_v0 = vadd.f32 %v1955_v18, %v1954_v14  ;;  %v1264_v18 = vpop.permute.xlu1 %1263 }
 0x24b   :  { %v1957_v54 = vpop.f32.mrb[8].mxu1  ;;  %v1348_v9 = vadd.f32 %v1956_v0, %v1244_v55  ;;  %v1586_v55 = vld [vmem:[%s3639_s1 + $0x68] sm:$0xff] }
 0x24c   :  { %v1958_v25 = vpop.f32.mrb[9].mxu1 }
 0x24d   :  { %v1959_v23 = vadd.f32 %v1958_v25, %v1957_v54 }
 0x24f   :  { %v1960_v20 = vpop.f32.mrb[10].mxu1  ;;  %v1353_v50 = vadd.f32 %v1959_v23, %v1249_v30 }
 0x250   :  { %v1961_v52 = vpop.f32.mrb[11].mxu1 }
 0x251   :  { %v1962_v56 = vadd.f32 %v1961_v52, %v1960_v20 }
 0x253   :  { %v1963_v24 = vpop.f32.mrb[12].mxu1  ;;  %v1358_v51 = vadd.f32 %v1962_v56, %v1254_v6 }
 0x254   :  { %v1964_v36 = vpop.f32.mrb[13].mxu1 }
 0x255   :  { %v1965_v63 = vadd.f32 %v1964_v36, %v1963_v24 }
 0x257   :  { %v1966_v42 = vpop.f32.mrb[14].mxu1  ;;  %v1363_v21 = vadd.f32 %v1965_v63, %v1259_v60 }
 0x258   :  { %v1967_v40 = vpop.f32.mrb[15].mxu1 }
 0x259   :  { %v1968_v48 = vadd.f32 %v1967_v40, %v1966_v42  ;;  %v1484_v40 = vld [vmem:[%s3638_s6] sm:$0x1f] }
 0x25b   :  { %v1368_v25 = vadd.f32 %v1968_v48, %v1264_v18  ;;  %v1573_v48 = vld [vmem:[%s3639_s1] sm:$0xff] }
 0x27b   :  { %v2001_v4 = vpop.f32.mrb[16].mxu1 }
 0x27c   :  { %v2002_v35 = vpop.f32.mrb[17].mxu1 }
 0x27d   :  { %v2003_v8 = vadd.f32 %v2002_v35, %v2001_v4  ;;  %v1574_v4 = vld [vmem:[%s3639_s1 + $0x8] sm:$0xff] }
 0x27e   :  { %v2358_v57 = vpack.c.bf16 %v1574_v4, %v1573_v48 }
 0x27f   :  { %v1438_v61 = vadd.f32 %v2003_v8, %v1333_v45  ;;  %v2004_v62 = vpop.f32.mrb[18].mxu1  ;;  %v1575_v45 = vld [vmem:[%s3639_s1 + $0x10] sm:$0xff]  ;;  %v1576_v8 = vld [vmem:[%s3639_s1 + $0x18] sm:$0xff] }
 0x280   :  { %v2005_v41 = vpop.f32.mrb[19].mxu1 }
 0x281   :  { %v2006_v58 = vadd.f32 %v2005_v41, %v2004_v62  ;;  %2523 = vtanh.f32 %v1438_v61  ;;  %v2362_v61 = vpack.c.bf16 %v1576_v8, %v1575_v45  ;;  %v1577_v62 = vld [vmem:[%s3639_s1 + $0x20] sm:$0xff] }
 0x282   :  { %v2366_v41 = vpack.c.bf16 %v1578_v27, %v1577_v62 }
 0x283   :  { %v1443_v10 = vadd.f32 %v2006_v58, %v1338_v37  ;;  %v2007_v38 = vpop.f32.mrb[20].mxu1  ;;  %v1579_v37 = vld [vmem:[%s3639_s1 + $0x30] sm:$0xff]  ;;  %v1580_v58 = vld [vmem:[%s3639_s1 + $0x38] sm:$0xff] }
 0x284   :  { %v2008_v47 = vpop.f32.mrb[21].mxu1 }
 0x285   :  { %2525 = vtanh.f32 %v1443_v10  ;;  %v2009_v59 = vadd.f32 %v2008_v47, %v2007_v38  ;;  %v2370_v10 = vpack.c.bf16 %v1580_v58, %v1579_v37  ;;  %v1581_v38 = vld [vmem:[%s3639_s1 + $0x40] sm:$0xff] }
 0x286   :  { %v2374_v47 = vpack.c.bf16 %v1582_v46, %v1581_v38 }
 0x287   :  { %v1448_v16 = vadd.f32 %v2009_v59, %v1343_v33  ;;  %v2010_v34 = vpop.f32.mrb[22].mxu1  ;;  %v1583_v33 = vld [vmem:[%s3639_s1 + $0x50] sm:$0xff]  ;;  %v1584_v59 = vld [vmem:[%s3639_s1 + $0x58] sm:$0xff] }
 0x288   :  { %v2011_v19 = vpop.f32.mrb[23].mxu1 }
 0x289   :  { %v2012_v3 = vadd.f32 %v2011_v19, %v2010_v34  ;;  %2527 = vtanh.f32 %v1448_v16  ;;  %v2378_v16 = vpack.c.bf16 %v1584_v59, %v1583_v33  ;;  %v1585_v34 = vld [vmem:[%s3639_s1 + $0x60] sm:$0xff] }
 0x28a   :  { %v2382_v19 = vpack.c.bf16 %v1586_v55, %v1585_v34 }
 0x28b   :  { %v1453_v17 = vadd.f32 %v2012_v3, %v1348_v9  ;;  %v2013_v44 = vpop.f32.mrb[24].mxu1  ;;  %v2524_v13 = vpop.eup %2523  ;;  %v1587_v9 = vld [vmem:[%s3639_s1 + $0x70] sm:$0xff]  ;;  %v1588_v3 = vld [vmem:[%s3639_s1 + $0x78] sm:$0xff] }
 0x28c   :  { %v2014_v29 = vpop.f32.mrb[25].mxu1 }
 0x28d   :  { %2529 = vtanh.f32 %v1453_v17  ;;  %v2015_v7 = vadd.f32 %v2014_v29, %v2013_v44  ;;  %v1566_v17 = vlaneseq  ;;  %v2386_v44 = vpack.c.bf16 %v1588_v3, %v1587_v9 }
 0x28f   :  { %v2526_v31 = vpop.eup %2525  ;;  %v1458_v22 = vadd.f32 %v2015_v7, %v1353_v50  ;;  %v2016_v39 = vpop.f32.mrb[26].mxu1  ;;  %v1567_v30 = vshrl.u32 %v1566_v17, 7  ;;  %v1569_v29 = vand.u32 127, %v1566_v17 }
 0x290   :  { %v2017_v26 = vpop.f32.mrb[27].mxu1  ;;  %v2346_v43 = vpack.c.bf16 %v2526_v31, %v2524_v13 }
 0x291   :  { %v2018_v28 = vadd.f32 %v2017_v26, %v2016_v39  ;;  %2531 = vtanh.f32 %v1458_v22  ;;  %vm1570_vm6 = vcmp.eq.s32.totalorder %v1567_v30, %v1569_v29 }
 0x292   :  { %2347 = vmatpush3.bf16.msra.mxu1 %v2346_v43  ;;  %v1815_v50 = vsel %vm1570_vm6, 1.0, %v2544_v49 }
 0x293   :  { %v1463_v2 = vadd.f32 %v2018_v28, %v1358_v51  ;;  %v2019_v5 = vpop.f32.mrb[28].mxu1  ;;  %2348 = vmatprep.subr.bf16.mxu1 %v2542_v1  ;;  %v2528_v15 = vpop.eup %2527 }
 0x294   :  { %v2020_v11 = vpop.f32.mrb[29].mxu1  ;;  %v1717_v51 = vpop.permute.xlu1 %1716 }
 0x295   :  { %2533 = vtanh.f32 %v1463_v2  ;;  %v2021_v53 = vadd.f32 %v2020_v11, %v2019_v5 }
 0x297   :  { %v2530_v12 = vpop.eup %2529  ;;  %v1468_v32 = vadd.f32 %v2021_v53, %v1363_v21  ;;  %v2022_v14 = vpop.f32.mrb[30].mxu1 }
 0x298   :  { %v2023_v0 = vpop.f32.mrb[31].mxu1  ;;  %v2349_v54 = vpack.c.bf16 %v2530_v12, %v2528_v15 }
 0x299   :  { %v2024_v23 = vadd.f32 %v2023_v0, %v2022_v14  ;;  %2535 = vtanh.f32 %v1468_v32 }
 0x29a   :  { %2350 = vmatpush3.bf16.msra.mxu1 %v2349_v54 }
 0x29b   :  { %v1473_v20 = vadd.f32 %v2024_v23, %v1368_v25  ;;  %2351 = vmatprep.subr.bf16.mxu1 %v2542_v1  ;;  %v2532_v52 = vpop.eup %2531 }
 0x29d   :  { %2537 = vtanh.f32 %v1473_v20 }
 0x29f   :  { %v2534_v56 = vpop.eup %2533 }
 0x2a0   :  { %v2352_v24 = vpack.c.bf16 %v2534_v56, %v2532_v52 }
 0x2a2   :  { %2353 = vmatpush3.bf16.msra.mxu1 %v2352_v24 }
 0x2a3   :  { %2354 = vmatprep.subr.bf16.mxu1 %v2542_v1  ;;  %v2536_v36 = vpop.eup %2535 }
 0x2a7   :  { %v2538_v63 = vpop.eup %2537 }
 0x2a8   :  { %v2355_v42 = vpack.c.bf16 %v2538_v63, %v2536_v36 }
 0x2aa   :  { %2356 = vmatpush3.bf16.msra.mxu1 %v2355_v42 }
 0x2ab   :  { %2357 = vmatprep.subr.bf16.mxu1 %v2542_v1 }
 0x2ad   :  { %2196 = vmatmul.mubr.msk.f32.vlgmr.msra.gmra.mrb[32].mxu1 %vm1491_vm3, %v1484_v40 }
 0x2ae   :  { %2230 = vmatprep.mubr.msk.f32.mxu1 %vm2543_vm2, %v2544_v49 }
 0x2b3   :  { %2360 = vmatpush3.bf16.xpose.msk.msra.mxu1 %vm3554_vm5, %v2358_v57 }
 0x2b4   :  { %2361 = vmatprep.subr.bf16.mxu1 %v2542_v1 }
 0x2bb   :  { %2364 = vmatpush3.bf16.xpose.msk.msra.mxu1 %vm3554_vm5, %v2362_v61 }
 0x2bc   :  { %2365 = vmatprep.subr.bf16.mxu1 %v2542_v1 }
 0x2c3   :  { %2368 = vmatpush3.bf16.xpose.msk.msra.mxu1 %vm3554_vm5, %v2366_v41 }
 0x2c4   :  { %2369 = vmatprep.subr.bf16.mxu1 %v2542_v1 }
 0x2cb   :  { %2372 = vmatpush3.bf16.xpose.msk.msra.mxu1 %vm3554_vm5, %v2370_v10 }
 0x2cc   :  { %2373 = vmatprep.subr.bf16.mxu1 %v2542_v1 }
 0x2d3   :  { %2376 = vmatpush3.bf16.xpose.msk.msra.mxu1 %vm3554_vm5, %v2374_v47 }
 0x2d4   :  { %2377 = vmatprep.subr.bf16.mxu1 %v2542_v1 }
 0x2db   :  { %2380 = vmatpush3.bf16.xpose.msk.msra.mxu1 %vm3554_vm5, %v2378_v16 }
 0x2dc   :  { %2381 = vmatprep.subr.bf16.mxu1 %v2542_v1 }
 0x2e3   :  { %2384 = vmatpush3.bf16.xpose.msk.msra.mxu1 %vm3554_vm5, %v2382_v19 }
 0x2e4   :  { %2385 = vmatprep.subr.bf16.mxu1 %v2542_v1  ;;  %v1489_v1 = vpop.permute.xlu0 %1488 }
 0x2eb   :  { %2388 = vmatpush3.bf16.xpose.msk.msra.mxu1 %vm3554_vm5, %v2386_v44 }
 0x2f2   :  { %2231 = vmatmul.mubr.msk.f32.vlgmr.msra.gmra.mrb[34].mxu1 %vm1589_vm4, %v1815_v50 }
 0x380   :  { %v1561_v7 = vpop.f32.mrb[32].mxu1 }
 0x381   :  { %v1562_v13 = vadd.f32 %v1561_v7, %v1489_v1  ;;  %v2197_v31 = vpop.f32.mrb[33].mxu1 }
 0x383   :  { %1729 = vst [vmem:[%s3640_s9 - $0x3] sm:$0x10] %v1562_v13  ;;  %2539 = vtanh.f32 %v1562_v13 }
 0x38d   :  { %v2540_v22 = vpop.eup %2539 }
 0x3c5   :  { %v1707_v39 = vpop.f32.mrb[34].mxu1 }
 0x3c6   :  { %v1711_v6 = vsub.f32 %v1707_v39, %v2540_v22  ;;  %v2232_v26 = vpop.f32.mrb[35].mxu1 }
 0x3c8   :  { %v1712_v43 = vmul.f32 %v1711_v6, %v1711_v6 }
 0x3ca   :  { %v1719_v28 = vmul.f32 %v1717_v51, %v1712_v43 }
 0x3cc   :  { %v1721_v49 = vsel %vm1720_vm7, %v1719_v28, 0.0 }
 0x3cd   :  { %v1722_v2 = vrot.slane %v1721_v49, 4 }
 0x3cf   :  { %v1723_v5 = vadd.f32 %v1722_v2, %v1721_v49 }
 0x3d1   :  { %v1724_v60 = vrot.slane %v1723_v5, 2 }
 0x3d3   :  { %v1725_v11 = vadd.f32 %v1724_v60, %v1723_v5 }
 0x3d5   :  { %v1726_v21 = vrot.slane %v1725_v11, 1 }
 0x3d7   :  { %v1727_v53 = vadd.f32 %v1726_v21, %v1725_v11 }
 0x3d9   :  { %1728 = vst [vmem:[%s3640_s9] sm:$0x1] %v1727_v53 }

</bundles_post_ra>
